<compile_context>
chip_gen: v7x
topology: tpu7x:2x2x1
jax: 0.10.0
libtpu: 0.0.40
codegen_flags: <defaults>
</compile_context>

<pallas_src>
import numpy as np

import jax
import jax.numpy as jnp
from jax.experimental import pallas as pl
from jax.experimental.pallas import tpu as pltpu

LANE = 128           # TPU vreg lane width; every padded feature dim is one lane block
HALF = LANE // 2     # lane-packing offset (shift by 64 is roll-direction-insensitive)
NEG_INF = -1e30      # log-softmax / attention mask value

# weight-slab tile indices (stacked (10, 128, 128) bf16)
W_TABLE, W_S, W_I, W_C, W_A, W_T, W_O1_AE, W_O1_QT, W_O2_AE, W_O2_QQ = range(10)
# mask-slab tile indices (stacked (3, 128, 128) bf16, trace-time constants)
M_POOL, M_REP, M_OWN = range(3)
# bias-slab row indices ((8, 128) f32)
B_S, B_I, B_T, B_O1, B_O2, B_MASK_T, B_MASK_V = range(7)


def basic_model_kernel(ids_ref, w_ref, m_ref, b_ref, out_ref):
    f32, bf16 = jnp.float32, jnp.bfloat16
    ntok = ids_ref.shape[0]          # token rows (state tokens then instruction tokens)
    lane = w_ref.shape[-1]
    half = lane // 2

    def mm(x, w):                    # bf16 MXU matmul, f32 accumulation
        return jnp.dot(x, w, preferred_element_type=f32)

    bias = b_ref[...]                # (8, 128) f32 — one vreg, loaded once

    def brow(i):                     # (1, 128) bias / mask row (static slice, free)
        return bias[i:i + 1, :]

    # ---- Embedding gather fused into the kernel as one-hot @ table (MXU).
    oh = (jax.lax.broadcasted_iota(jnp.int32, (ntok, lane), 1)
          == ids_ref[...]).astype(bf16)                                 # (ntok, lane)
    emb = mm(oh, w_ref[W_TABLE]).astype(bf16)                           # (ntok, lane)

    # ---- StateEncoder: mean-pool (precomputed POOL mask, MXU) -> Linear -> ReLU.
    state_pool = mm(m_ref[M_POOL], emb).astype(bf16)                    # (lane, lane)
    enc = jnp.maximum(mm(state_pool, w_ref[W_S]) + brow(B_S), 0.0)      # f32, lanes 0:2H
    enc_b = enc.astype(bf16)

    # ---- InstructionEncoder: per-token tanh(W_i e + W_c enc_{batch} + b).
    ctx = mm(m_ref[M_REP], mm(enc_b, w_ref[W_C]).astype(bf16))          # replicate to tokens
    h = jnp.tanh(mm(emb, w_ref[W_I]) + ctx + brow(B_I))                 # (ntok, lane) f32
    h_b = h.astype(bf16)

    # ---- BasicAttender: bilinear scores on the MXU (q @ h^T), masked softmax,
    #      MXU aggregation.  Precomputed owner mask selects each batch's tokens.
    query = mm(enc_b, w_ref[W_A]).astype(bf16)                          # (lane, lane)
    scores = jax.lax.dot_general(query, h_b, (((1,), (1,)), ((), ())),
                                 preferred_element_type=f32)            # (batch, token)
    scores = jnp.where(m_ref[M_OWN] > 0, scores, NEG_INF)
    mx = jnp.max(scores, axis=-1, keepdims=True)
    e = jnp.exp(scores - mx)
    alpha = e * pl.reciprocal(jnp.sum(e, axis=-1, keepdims=True), approx=True)
    attended = mm(alpha.astype(bf16), h_b)                              # (lane, lane) f32

    # ---- Scorers: lane-pack [attended | enc] once (XLU roll, free slot) so each
    #      scorer is 1-2 single-tile MXU matmuls instead of 2-4.
    ae = (attended + pltpu.roll(enc, half, 1)).astype(bf16)             # [att(0:64)|enc(64:)]
    q_t = mm(ae, w_ref[W_T]) + brow(B_T)                                # lanes 0:T, rest 0
    q_o1 = (mm(ae, w_ref[W_O1_AE])
            + mm(q_t.astype(bf16), w_ref[W_O1_QT]) + brow(B_O1))        # lanes 0:V, rest 0
    qq = (q_t + pltpu.roll(q_o1, half, 1)).astype(bf16)                 # [q_t(0:T)|q_o1(64:)]
    q_o2 = mm(ae, w_ref[W_O2_AE]) + mm(qq, w_ref[W_O2_QQ]) + brow(B_O2)

    def log_softmax(x):              # padded lanes carry NEG_INF (added just below)
        m_ = jnp.max(x, axis=-1, keepdims=True)
        s = x - m_
        return s - jnp.log(jnp.sum(jnp.exp(s), axis=-1, keepdims=True))

    # Single lane-dense store: (rows, 3*LANE); the -inf lane mask is applied only
    # here, so the q_t / q_o1 values reused above stay clean (exact zeros in padding).
    packed = jnp.concatenate([log_softmax(q_t + brow(B_MASK_T)),
                              log_softmax(q_o1 + brow(B_MASK_V)),
                              log_softmax(q_o2 + brow(B_MASK_V))], axis=-1)
    out_ref[...] = packed[:out_ref.shape[0], :]


def init_params(key, *, vocab_size, embedding_size, hidden_size,
                template_size, output_vocab_size, **unused):
    """Deterministic init; all weights packed into one (10,128,128) bf16 slab and all
    biases / log-softmax lane masks into one (8,128) f32 slab."""
    E, H = embedding_size, hidden_size
    H2 = 2 * H
    T, V = template_size, output_vocab_size
    assert max(vocab_size, E) <= LANE and max(H2, T, V) <= HALF, \
        "TODO(synk): tile weights over multiple 128-lane blocks for larger configs"

    ks = jax.random.split(key, 8)

    def lin(k, fi, fo):
        return jax.random.normal(k, (fi, fo), jnp.float32) / jnp.sqrt(fi)

    emb = jax.random.normal(ks[0], (vocab_size, E), jnp.float32) * 0.1
    w_s = lin(ks[1], E, H2)
    w_i = lin(ks[2], E, H2)
    w_c = lin(ks[3], H2, H2)
    w_a = lin(ks[4], H2, H2)
    w_t = lin(ks[5], 2 * H2, T)                 # rows: [attended ; enc]
    w_o1 = lin(ks[6], 2 * H2 + T, V)            # rows: [attended ; enc ; q_t]
    w_o2 = lin(ks[7], 2 * H2 + T + V, V)        # rows: [attended ; enc ; q_t ; q_o1]

    def tile(*placements):
        """(LANE, LANE) f32 tile with weight blocks placed at given row offsets."""
        w = np.zeros((LANE, LANE), np.float32)
        for off, blk in placements:
            blk = np.asarray(blk)
            r, c = blk.shape
            w[off:off + r, :c] = blk
        return w

    wslab = jnp.asarray(np.stack([
        tile((0, emb)),                                          # W_TABLE
        tile((0, w_s)),                                          # W_S
        tile((0, w_i)),                                          # W_I
        tile((0, w_c)),                                          # W_C
        tile((0, w_a)),                                          # W_A
        tile((0, w_t[:H2]), (HALF, w_t[H2:])),                   # W_T     packed [att|enc]
        tile((0, w_o1[:H2]), (HALF, w_o1[H2:2 * H2])),           # W_O1_AE packed [att|enc]
        tile((0, w_o1[2 * H2:])),                                # W_O1_QT (q_t rows)
        tile((0, w_o2[:H2]), (HALF, w_o2[H2:2 * H2])),           # W_O2_AE packed [att|enc]
        tile((0, w_o2[2 * H2:2 * H2 + T]),                       # W_O2_QQ packed
             (HALF, w_o2[2 * H2 + T:])),                         #   [q_t rows | q_o1 rows]
    ]), dtype=jnp.bfloat16)                                      # (10, 128, 128)

    def lsmask(width):               # 0 on valid lanes, NEG_INF on padded lanes
        m = np.full((LANE,), NEG_INF, np.float32)
        m[:width] = 0.0
        return m

    bslab = jnp.asarray(np.stack([
        np.zeros((LANE,), np.float32),     # B_S
        np.zeros((LANE,), np.float32),     # B_I
        np.zeros((LANE,), np.float32),     # B_T
        np.zeros((LANE,), np.float32),     # B_O1
        np.zeros((LANE,), np.float32),     # B_O2
        lsmask(T),                         # B_MASK_T (log-softmax lane mask)
        lsmask(V),                         # B_MASK_V
        np.zeros((LANE,), np.float32),     # pad to 8 sublanes
    ]))                                    # (8, 128) f32

    return dict(wslab=wslab, bslab=bslab)


def make_forward(template_size, output_vocab_size):
    """Builds jitted forward(params, state_ids, instr_ids) -> (logp_t, logp_o1, logp_o2)."""
    T, V = template_size, output_vocab_size

    @jax.jit
    def forward(params, state_ids, instr_ids):
        B, ls = state_ids.shape
        _, li = instr_ids.shape
        ns, ni = B * ls, B * li
        assert ns + ni <= LANE and B <= LANE, \
            "TODO(synk): add a token/batch grid axis for larger inputs"

        # One combined token-id column: state tokens, then instruction tokens.
        tok = jnp.concatenate([state_ids.reshape(-1),
                               instr_ids.reshape(-1)]).astype(jnp.int32)
        tok = jnp.pad(tok, (0, LANE - ns - ni)).reshape(LANE, 1)

        # Static pooling / replication / attention-owner masks, built with numpy at
        # trace time => jit constants, no per-call iota/compare/select anywhere.
        pool = np.zeros((LANE, LANE), np.float32)   # [batch, token]  mean-pool weights
        rep = np.zeros((LANE, LANE), np.float32)    # [token, batch]  ctx replicator
        own = np.zeros((LANE, LANE), np.float32)    # [batch, token]  attention owner
        for b in range(B):
            pool[b, b * ls:(b + 1) * ls] = 1.0 / ls
            rep[ns + b * li: ns + (b + 1) * li, b] = 1.0
            own[b, ns + b * li: ns + (b + 1) * li] = 1.0
        mslab = jnp.asarray(np.stack([pool, rep, own]), dtype=jnp.bfloat16)

        vmem = pl.BlockSpec(memory_space=pltpu.MemorySpace.VMEM)
        b_out = -(-B // 8) * 8                      # sublane-aligned output rows

        # TODO(synk): for realistic batch sizes add a batch grid axis with
        # dimension_semantics=("parallel",) and constant index_maps on the weight
        # slab so it stays VMEM-resident (v7x has 2 TensorCores); at this size the
        # single-shot, everything-resident structure is optimal (<1 MiB footprint).
        out = pl.pallas_call(
            basic_model_kernel,
            out_shape=jax.ShapeDtypeStruct((b_out, 3 * LANE), jnp.float32),
            in_specs=[vmem, vmem, vmem, vmem],
            out_specs=vmem,
        )(tok, params['wslab'], mslab, params['bslab'])

        # Un-pack the lane-dense output slab.
        return (out[:B, :T],
                out[:B, LANE:LANE + V],
                out[:B, 2 * LANE:2 * LANE + V])

    return forward


if __name__ == "__main__":
    args = dict(vocab_size=32, embedding_size=16, hidden_size=32,
                template_size=8, output_vocab_size=16, spm_path=None)
    B, L_STATE, L_INSTR = 2, 8, 8

    key = jax.random.PRNGKey(0)
    k_params, k_state, k_instr = jax.random.split(key, 3)
    params = init_params(k_params, **args)
    forward = make_forward(args['template_size'], args['output_vocab_size'])

    state_ids = jax.random.randint(k_state, (B, L_STATE), 0, args['vocab_size'], jnp.int32)
    instr_ids = jax.random.randint(k_instr, (B, L_INSTR), 0, args['vocab_size'], jnp.int32)

    logp_t, logp_o1, logp_o2 = forward(params, state_ids, instr_ids)
    jax.block_until_ready((logp_t, logp_o1, logp_o2))

    assert logp_t.shape == (B, args['template_size'])
    assert logp_o1.shape == (B, args['output_vocab_size'])
    assert logp_o2.shape == (B, args['output_vocab_size'])
    # log_softmax rows must sum (in prob space) to ~1
    assert bool(jnp.allclose(jnp.sum(jnp.exp(logp_t), axis=1), 1.0, atol=1e-4))
    assert bool(jnp.allclose(jnp.sum(jnp.exp(logp_o1), axis=1), 1.0, atol=1e-4))
    assert bool(jnp.allclose(jnp.sum(jnp.exp(logp_o2), axis=1), 1.0, atol=1e-4))
    print("KERNEL_OK")
</pallas_src>

<mosaic_0001>
module attributes {stable_mosaic.version = 11 : i64} {
  func.func @basic_model_kernel(%arg0: memref<128x1xi32, #tpu.memory_space<vmem>>, %arg1: memref<10x128x128xbf16, #tpu.memory_space<vmem>>, %arg2: memref<3x128x128xbf16, #tpu.memory_space<vmem>>, %arg3: memref<8x128xf32, #tpu.memory_space<vmem>>, %arg4: memref<8x384xf32, #tpu.memory_space<vmem>>) attributes {dimension_semantics = [], scalar_prefetch = 0 : i64, scratch_operands = 0 : i64, tpu.core_type = #tpu.core_type<tc>} {
    %c0 = arith.constant 0 : index
    %c0_0 = arith.constant 0 : index
    %0 = vector.load %arg3[%c0, %c0_0] : memref<8x128xf32, #tpu.memory_space<vmem>>, vector<8x128xf32>
    %1 = tpu.iota {dimensions = array<i32: 1>} : vector<128x128xi32>
    %c0_1 = arith.constant 0 : index
    %c0_2 = arith.constant 0 : index
    %2 = vector.load %arg0[%c0_1, %c0_2] : memref<128x1xi32, #tpu.memory_space<vmem>>, vector<128x1xi32>
    %3 = vector.broadcast %2 : vector<128x1xi32> to vector<128x128xi32>
    %4 = arith.cmpi eq, %1, %3 : vector<128x128xi32>
    %5 = arith.extui %4 : vector<128x128xi1> to vector<128x128xi32>
    %6 = arith.sitofp %5 : vector<128x128xi32> to vector<128x128xf32>
    %7 = arith.truncf %6 : vector<128x128xf32> to vector<128x128xbf16>
    %c0_3 = arith.constant 0 : index
    %c0_4 = arith.constant 0 : index
    %c0_5 = arith.constant 0 : index
    %8 = vector.load %arg1[%c0_3, %c0_4, %c0_5] : memref<10x128x128xbf16, #tpu.memory_space<vmem>>, vector<1x128x128xbf16>
    %9 = vector.shape_cast %8 : vector<1x128x128xbf16> to vector<128x128xbf16>
    %cst = arith.constant dense<0.000000e+00> : vector<128x128xf32>
    %10 = tpu.matmul %7, %9, %cst {dimension_numbers = #tpu.dot_dimension_numbers<[1], [0], [0], [1], [0, 0, 1, 1], [], []>} : vector<128x128xbf16>, vector<128x128xbf16>, vector<128x128xf32> -> vector<128x128xf32>
    %11 = arith.truncf %10 : vector<128x128xf32> to vector<128x128xbf16>
    %c0_6 = arith.constant 0 : index
    %c0_7 = arith.constant 0 : index
    %c0_8 = arith.constant 0 : index
    %12 = vector.load %arg2[%c0_6, %c0_7, %c0_8] : memref<3x128x128xbf16, #tpu.memory_space<vmem>>, vector<1x128x128xbf16>
    %13 = vector.shape_cast %12 : vector<1x128x128xbf16> to vector<128x128xbf16>
    %cst_9 = arith.constant dense<0.000000e+00> : vector<128x128xf32>
    %14 = tpu.matmul %13, %11, %cst_9 {dimension_numbers = #tpu.dot_dimension_numbers<[1], [0], [0], [1], [0, 0, 1, 1], [], []>} : vector<128x128xbf16>, vector<128x128xbf16>, vector<128x128xf32> -> vector<128x128xf32>
    %15 = arith.truncf %14 : vector<128x128xf32> to vector<128x128xbf16>
    %c1 = arith.constant 1 : index
    %c0_10 = arith.constant 0 : index
    %c0_11 = arith.constant 0 : index
    %16 = vector.load %arg1[%c1, %c0_10, %c0_11] : memref<10x128x128xbf16, #tpu.memory_space<vmem>>, vector<1x128x128xbf16>
    %17 = vector.shape_cast %16 : vector<1x128x128xbf16> to vector<128x128xbf16>
    %cst_12 = arith.constant dense<0.000000e+00> : vector<128x128xf32>
    %18 = tpu.matmul %15, %17, %cst_12 {dimension_numbers = #tpu.dot_dimension_numbers<[1], [0], [0], [1], [0, 0, 1, 1], [], []>} : vector<128x128xbf16>, vector<128x128xbf16>, vector<128x128xf32> -> vector<128x128xf32>
    %19 = vector.extract_strided_slice %0 {offsets = [0, 0], sizes = [1, 128], strides = [1, 1]} : vector<8x128xf32> to vector<1x128xf32>
    %20 = vector.broadcast %19 : vector<1x128xf32> to vector<128x128xf32>
    %21 = arith.addf %18, %20 : vector<128x128xf32>
    %cst_13 = arith.constant 0.000000e+00 : f32
    %22 = vector.broadcast %cst_13 : f32 to vector<128x128xf32>
    %23 = arith.maximumf %21, %22 : vector<128x128xf32>
    %24 = arith.truncf %23 : vector<128x128xf32> to vector<128x128xbf16>
    %c1_14 = arith.constant 1 : index
    %c0_15 = arith.constant 0 : index
    %c0_16 = arith.constant 0 : index
    %25 = vector.load %arg2[%c1_14, %c0_15, %c0_16] : memref<3x128x128xbf16, #tpu.memory_space<vmem>>, vector<1x128x128xbf16>
    %26 = vector.shape_cast %25 : vector<1x128x128xbf16> to vector<128x128xbf16>
    %c3 = arith.constant 3 : index
    %c0_17 = arith.constant 0 : index
    %c0_18 = arith.constant 0 : index
    %27 = vector.load %arg1[%c3, %c0_17, %c0_18] : memref<10x128x128xbf16, #tpu.memory_space<vmem>>, vector<1x128x128xbf16>
    %28 = vector.shape_cast %27 : vector<1x128x128xbf16> to vector<128x128xbf16>
    %cst_19 = arith.constant dense<0.000000e+00> : vector<128x128xf32>
    %29 = tpu.matmul %24, %28, %cst_19 {dimension_numbers = #tpu.dot_dimension_numbers<[1], [0], [0], [1], [0, 0, 1, 1], [], []>} : vector<128x128xbf16>, vector<128x128xbf16>, vector<128x128xf32> -> vector<128x128xf32>
    %30 = arith.truncf %29 : vector<128x128xf32> to vector<128x128xbf16>
    %cst_20 = arith.constant dense<0.000000e+00> : vector<128x128xf32>
    %31 = tpu.matmul %26, %30, %cst_20 {dimension_numbers = #tpu.dot_dimension_numbers<[1], [0], [0], [1], [0, 0, 1, 1], [], []>} : vector<128x128xbf16>, vector<128x128xbf16>, vector<128x128xf32> -> vector<128x128xf32>
    %c2 = arith.constant 2 : index
    %c0_21 = arith.constant 0 : index
    %c0_22 = arith.constant 0 : index
    %32 = vector.load %arg1[%c2, %c0_21, %c0_22] : memref<10x128x128xbf16, #tpu.memory_space<vmem>>, vector<1x128x128xbf16>
    %33 = vector.shape_cast %32 : vector<1x128x128xbf16> to vector<128x128xbf16>
    %cst_23 = arith.constant dense<0.000000e+00> : vector<128x128xf32>
    %34 = tpu.matmul %11, %33, %cst_23 {dimension_numbers = #tpu.dot_dimension_numbers<[1], [0], [0], [1], [0, 0, 1, 1], [], []>} : vector<128x128xbf16>, vector<128x128xbf16>, vector<128x128xf32> -> vector<128x128xf32>
    %35 = arith.addf %34, %31 : vector<128x128xf32>
    %36 = vector.extract_strided_slice %0 {offsets = [1, 0], sizes = [1, 128], strides = [1, 1]} : vector<8x128xf32> to vector<1x128xf32>
    %37 = vector.broadcast %36 : vector<1x128xf32> to vector<128x128xf32>
    %38 = arith.addf %35, %37 : vector<128x128xf32>
    %39 = math.tanh %38 : vector<128x128xf32>
    %40 = arith.truncf %39 : vector<128x128xf32> to vector<128x128xbf16>
    %c4 = arith.constant 4 : index
    %c0_24 = arith.constant 0 : index
    %c0_25 = arith.constant 0 : index
    %41 = vector.load %arg1[%c4, %c0_24, %c0_25] : memref<10x128x128xbf16, #tpu.memory_space<vmem>>, vector<1x128x128xbf16>
    %42 = vector.shape_cast %41 : vector<1x128x128xbf16> to vector<128x128xbf16>
    %cst_26 = arith.constant dense<0.000000e+00> : vector<128x128xf32>
    %43 = tpu.matmul %24, %42, %cst_26 {dimension_numbers = #tpu.dot_dimension_numbers<[1], [0], [0], [1], [0, 0, 1, 1], [], []>} : vector<128x128xbf16>, vector<128x128xbf16>, vector<128x128xf32> -> vector<128x128xf32>
    %44 = arith.truncf %43 : vector<128x128xf32> to vector<128x128xbf16>
    %cst_27 = arith.constant dense<0.000000e+00> : vector<128x128xf32>
    %45 = tpu.matmul %44, %40, %cst_27 {dimension_numbers = #tpu.dot_dimension_numbers<[1], [1], [0], [0], [0, 0, 1, 0], [], []>} : vector<128x128xbf16>, vector<128x128xbf16>, vector<128x128xf32> -> vector<128x128xf32>
    %c2_28 = arith.constant 2 : index
    %c0_29 = arith.constant 0 : index
    %c0_30 = arith.constant 0 : index
    %46 = vector.load %arg2[%c2_28, %c0_29, %c0_30] : memref<3x128x128xbf16, #tpu.memory_space<vmem>>, vector<1x128x128xbf16>
    %47 = vector.shape_cast %46 : vector<1x128x128xbf16> to vector<128x128xbf16>
    %cst_31 = arith.constant 0.000000e+00 : bf16
    %48 = vector.broadcast %cst_31 : bf16 to vector<128x128xbf16>
    %49 = arith.cmpf ogt, %47, %48 : vector<128x128xbf16>
    %cst_32 = arith.constant -1.000000e+30 : f32
    %50 = vector.broadcast %cst_32 : f32 to vector<128x128xf32>
    %51 = arith.select %49, %45, %50 : vector<128x128xi1>, vector<128x128xf32>
    %cst_33 = arith.constant dense<0xFF800000> : vector<128xf32>
    %52 = vector.multi_reduction <maximumf>, %51, %cst_33 [1] : vector<128x128xf32> to vector<128xf32>
    %53 = vector.shape_cast %52 : vector<128xf32> to vector<128x1xf32>
    %54 = vector.broadcast %53 : vector<128x1xf32> to vector<128x128xf32>
    %55 = arith.subf %51, %54 : vector<128x128xf32>
    %56 = math.exp %55 : vector<128x128xf32>
    %cst_34 = arith.constant dense<0.000000e+00> : vector<128xf32>
    %57 = vector.multi_reduction <add>, %56, %cst_34 [1] : vector<128x128xf32> to vector<128xf32>
    %58 = vector.shape_cast %57 : vector<128xf32> to vector<128x1xf32>
    %59 = tpu.reciprocal %58 {approx = true} : vector<128x1xf32> -> vector<128x1xf32>
    %60 = vector.broadcast %59 : vector<128x1xf32> to vector<128x128xf32>
    %61 = arith.mulf %56, %60 : vector<128x128xf32>
    %62 = arith.truncf %61 : vector<128x128xf32> to vector<128x128xbf16>
    %cst_35 = arith.constant dense<0.000000e+00> : vector<128x128xf32>
    %63 = tpu.matmul %62, %40, %cst_35 {dimension_numbers = #tpu.dot_dimension_numbers<[1], [0], [0], [1], [0, 0, 1, 1], [], []>} : vector<128x128xbf16>, vector<128x128xbf16>, vector<128x128xf32> -> vector<128x128xf32>
    %c64_i32 = arith.constant 64 : i32
    %64 = tpu.dynamic_rotate %23 by %c64_i32 dim 1 : vector<128x128xf32>, i32 -> vector<128x128xf32>
    %65 = arith.addf %63, %64 : vector<128x128xf32>
    %66 = arith.truncf %65 : vector<128x128xf32> to vector<128x128xbf16>
    %c5 = arith.constant 5 : index
    %c0_36 = arith.constant 0 : index
    %c0_37 = arith.constant 0 : index
    %67 = vector.load %arg1[%c5, %c0_36, %c0_37] : memref<10x128x128xbf16, #tpu.memory_space<vmem>>, vector<1x128x128xbf16>
    %68 = vector.shape_cast %67 : vector<1x128x128xbf16> to vector<128x128xbf16>
    %cst_38 = arith.constant dense<0.000000e+00> : vector<128x128xf32>
    %69 = tpu.matmul %66, %68, %cst_38 {dimension_numbers = #tpu.dot_dimension_numbers<[1], [0], [0], [1], [0, 0, 1, 1], [], []>} : vector<128x128xbf16>, vector<128x128xbf16>, vector<128x128xf32> -> vector<128x128xf32>
    %70 = vector.extract_strided_slice %0 {offsets = [2, 0], sizes = [1, 128], strides = [1, 1]} : vector<8x128xf32> to vector<1x128xf32>
    %71 = vector.broadcast %70 : vector<1x128xf32> to vector<128x128xf32>
    %72 = arith.addf %69, %71 : vector<128x128xf32>
    %c6 = arith.constant 6 : index
    %c0_39 = arith.constant 0 : index
    %c0_40 = arith.constant 0 : index
    %73 = vector.load %arg1[%c6, %c0_39, %c0_40] : memref<10x128x128xbf16, #tpu.memory_space<vmem>>, vector<1x128x128xbf16>
    %74 = vector.shape_cast %73 : vector<1x128x128xbf16> to vector<128x128xbf16>
    %cst_41 = arith.constant dense<0.000000e+00> : vector<128x128xf32>
    %75 = tpu.matmul %66, %74, %cst_41 {dimension_numbers = #tpu.dot_dimension_numbers<[1], [0], [0], [1], [0, 0, 1, 1], [], []>} : vector<128x128xbf16>, vector<128x128xbf16>, vector<128x128xf32> -> vector<128x128xf32>
    %76 = arith.truncf %72 : vector<128x128xf32> to vector<128x128xbf16>
    %c7 = arith.constant 7 : index
    %c0_42 = arith.constant 0 : index
    %c0_43 = arith.constant 0 : index
    %77 = vector.load %arg1[%c7, %c0_42, %c0_43] : memref<10x128x128xbf16, #tpu.memory_space<vmem>>, vector<1x128x128xbf16>
    %78 = vector.shape_cast %77 : vector<1x128x128xbf16> to vector<128x128xbf16>
    %cst_44 = arith.constant dense<0.000000e+00> : vector<128x128xf32>
    %79 = tpu.matmul %76, %78, %cst_44 {dimension_numbers = #tpu.dot_dimension_numbers<[1], [0], [0], [1], [0, 0, 1, 1], [], []>} : vector<128x128xbf16>, vector<128x128xbf16>, vector<128x128xf32> -> vector<128x128xf32>
    %80 = arith.addf %75, %79 : vector<128x128xf32>
    %81 = vector.extract_strided_slice %0 {offsets = [3, 0], sizes = [1, 128], strides = [1, 1]} : vector<8x128xf32> to vector<1x128xf32>
    %82 = vector.broadcast %81 : vector<1x128xf32> to vector<128x128xf32>
    %83 = arith.addf %80, %82 : vector<128x128xf32>
    %c64_i32_45 = arith.constant 64 : i32
    %84 = tpu.dynamic_rotate %83 by %c64_i32_45 dim 1 : vector<128x128xf32>, i32 -> vector<128x128xf32>
    %85 = arith.addf %72, %84 : vector<128x128xf32>
    %86 = arith.truncf %85 : vector<128x128xf32> to vector<128x128xbf16>
    %c8 = arith.constant 8 : index
    %c0_46 = arith.constant 0 : index
    %c0_47 = arith.constant 0 : index
    %87 = vector.load %arg1[%c8, %c0_46, %c0_47] : memref<10x128x128xbf16, #tpu.memory_space<vmem>>, vector<1x128x128xbf16>
    %88 = vector.shape_cast %87 : vector<1x128x128xbf16> to vector<128x128xbf16>
    %cst_48 = arith.constant dense<0.000000e+00> : vector<128x128xf32>
    %89 = tpu.matmul %66, %88, %cst_48 {dimension_numbers = #tpu.dot_dimension_numbers<[1], [0], [0], [1], [0, 0, 1, 1], [], []>} : vector<128x128xbf16>, vector<128x128xbf16>, vector<128x128xf32> -> vector<128x128xf32>
    %c9 = arith.constant 9 : index
    %c0_49 = arith.constant 0 : index
    %c0_50 = arith.constant 0 : index
    %90 = vector.load %arg1[%c9, %c0_49, %c0_50] : memref<10x128x128xbf16, #tpu.memory_space<vmem>>, vector<1x128x128xbf16>
    %91 = vector.shape_cast %90 : vector<1x128x128xbf16> to vector<128x128xbf16>
    %cst_51 = arith.constant dense<0.000000e+00> : vector<128x128xf32>
    %92 = tpu.matmul %86, %91, %cst_51 {dimension_numbers = #tpu.dot_dimension_numbers<[1], [0], [0], [1], [0, 0, 1, 1], [], []>} : vector<128x128xbf16>, vector<128x128xbf16>, vector<128x128xf32> -> vector<128x128xf32>
    %93 = arith.addf %89, %92 : vector<128x128xf32>
    %94 = vector.extract_strided_slice %0 {offsets = [4, 0], sizes = [1, 128], strides = [1, 1]} : vector<8x128xf32> to vector<1x128xf32>
    %95 = vector.broadcast %94 : vector<1x128xf32> to vector<128x128xf32>
    %96 = arith.addf %93, %95 : vector<128x128xf32>
    %97 = vector.extract_strided_slice %0 {offsets = [5, 0], sizes = [1, 128], strides = [1, 1]} : vector<8x128xf32> to vector<1x128xf32>
    %98 = vector.broadcast %97 : vector<1x128xf32> to vector<128x128xf32>
    %99 = arith.addf %72, %98 : vector<128x128xf32>
    %cst_52 = arith.constant dense<0xFF800000> : vector<128xf32>
    %100 = vector.multi_reduction <maximumf>, %99, %cst_52 [1] : vector<128x128xf32> to vector<128xf32>
    %101 = vector.shape_cast %100 : vector<128xf32> to vector<128x1xf32>
    %102 = vector.broadcast %101 : vector<128x1xf32> to vector<128x128xf32>
    %103 = arith.subf %99, %102 : vector<128x128xf32>
    %104 = math.exp %103 : vector<128x128xf32>
    %cst_53 = arith.constant dense<0.000000e+00> : vector<128xf32>
    %105 = vector.multi_reduction <add>, %104, %cst_53 [1] : vector<128x128xf32> to vector<128xf32>
    %106 = vector.shape_cast %105 : vector<128xf32> to vector<128x1xf32>
    %107 = math.log %106 : vector<128x1xf32>
    %108 = vector.broadcast %107 : vector<128x1xf32> to vector<128x128xf32>
    %109 = arith.subf %103, %108 : vector<128x128xf32>
    %110 = vector.extract_strided_slice %0 {offsets = [6, 0], sizes = [1, 128], strides = [1, 1]} : vector<8x128xf32> to vector<1x128xf32>
    %111 = vector.broadcast %110 : vector<1x128xf32> to vector<128x128xf32>
    %112 = arith.addf %83, %111 : vector<128x128xf32>
    %cst_54 = arith.constant dense<0xFF800000> : vector<128xf32>
    %113 = vector.multi_reduction <maximumf>, %112, %cst_54 [1] : vector<128x128xf32> to vector<128xf32>
    %114 = vector.shape_cast %113 : vector<128xf32> to vector<128x1xf32>
    %115 = vector.broadcast %114 : vector<128x1xf32> to vector<128x128xf32>
    %116 = arith.subf %112, %115 : vector<128x128xf32>
    %117 = math.exp %116 : vector<128x128xf32>
    %cst_55 = arith.constant dense<0.000000e+00> : vector<128xf32>
    %118 = vector.multi_reduction <add>, %117, %cst_55 [1] : vector<128x128xf32> to vector<128xf32>
    %119 = vector.shape_cast %118 : vector<128xf32> to vector<128x1xf32>
    %120 = math.log %119 : vector<128x1xf32>
    %121 = vector.broadcast %120 : vector<128x1xf32> to vector<128x128xf32>
    %122 = arith.subf %116, %121 : vector<128x128xf32>
    %123 = vector.extract_strided_slice %0 {offsets = [6, 0], sizes = [1, 128], strides = [1, 1]} : vector<8x128xf32> to vector<1x128xf32>
    %124 = vector.broadcast %123 : vector<1x128xf32> to vector<128x128xf32>
    %125 = arith.addf %96, %124 : vector<128x128xf32>
    %cst_56 = arith.constant dense<0xFF800000> : vector<128xf32>
    %126 = vector.multi_reduction <maximumf>, %125, %cst_56 [1] : vector<128x128xf32> to vector<128xf32>
    %127 = vector.shape_cast %126 : vector<128xf32> to vector<128x1xf32>
    %128 = vector.broadcast %127 : vector<128x1xf32> to vector<128x128xf32>
    %129 = arith.subf %125, %128 : vector<128x128xf32>
    %130 = math.exp %129 : vector<128x128xf32>
    %cst_57 = arith.constant dense<0.000000e+00> : vector<128xf32>
    %131 = vector.multi_reduction <add>, %130, %cst_57 [1] : vector<128x128xf32> to vector<128xf32>
    %132 = vector.shape_cast %131 : vector<128xf32> to vector<128x1xf32>
    %133 = math.log %132 : vector<128x1xf32>
    %134 = vector.broadcast %133 : vector<128x1xf32> to vector<128x128xf32>
    %135 = arith.subf %129, %134 : vector<128x128xf32>
    %136 = tpu.concatenate %109, %122, %135 in 1 : vector<128x128xf32>, vector<128x128xf32>, vector<128x128xf32> -> vector<128x384xf32>
    %137 = vector.extract_strided_slice %136 {offsets = [0, 0], sizes = [8, 384], strides = [1, 1]} : vector<128x384xf32> to vector<8x384xf32>
    %c0_58 = arith.constant 0 : index
    %c0_59 = arith.constant 0 : index
    %138 = vector.load %arg4[%c0_58, %c0_59] : memref<8x384xf32, #tpu.memory_space<vmem>>, vector<8x384xf32>
    tpu.vector_store %arg4[%c0_58, %c0_59], %137 {strides = array<i32>} : memref<8x384xf32, #tpu.memory_space<vmem>>, vector<8x384xf32>,
    return
  }
}

</mosaic_0001>

<bundles_post_ra>
// kernel: forward.1
= control target key start
LH: loop header
LB: loop body
LE: loop exit
PB: predicated region body
PF: predicated region fallthrough
CT: control target
= control target key end

     0   :  { %9 = vsyncpa [#allocation3], 0  ;;  %s4668_s0 = inlined_call_operand.vmem [shape: s32[128,1], index: 0, kind: input, shape index: {}]   ;;  %s4669_s1 = inlined_call_operand.hbm [shape: bf16[10,128,128], index: 1, kind: input, shape index: {}]   ;;  %s4670_s2 = inlined_call_operand.hbm [shape: bf16[3,128,128], index: 2, kind: input, shape index: {}]   ;;  %s4671_s3 = inlined_call_operand.vmem [shape: f32[8,128], index: 3, kind: input, shape index: {}]   ;;  %s4672_s4 = inlined_call_operand.vmem [shape: f32[8,384], index: 4, kind: output, shape index: {}]  }
   0x1   :  { %10 = vsyncpa [#allocation5], 0  ;;  %s3922_s15 = smov [#allocation2]   ;;  %s3874_s19 = scalar_lea.hbm %s4669_s1, 10240 }
   0x2   :  { %s18_s16 = sshll.u32 %s3922_s15, 4  ;;  %p3875_p0 = scmp.ne.s32.totalorder %s4669_s1, %s3874_s19  ;;  %s19_s16 = int_to_ptr.vmem [resolvable:$true] %s18_s16 }
   0x3   :  { %p3878_p1 = scmp.lt.u32.totalorder %s3874_s19, %s4669_s1 }
   0x5   :  { %p3880_p2 = pnand %p3878_p1, %p3875_p0 }
   0x7   :  { %3883 = shalt.err (!%p3880_p2)
}
   0x8   :  { %s3884_s24 = scalar_lea.vmem %s19_s16, 10240  ;;  %p3889_p4 = scmp.lt.s32.totalorder %s19_s16, %s19_s16 }
   0x9   :  { %p3885_p3 = scmp.ne.s32.totalorder %s19_s16, %s3884_s24  ;;  %p3890_p5 = scmp.lt.s32.totalorder %s3884_s24, %s3884_s24 }
   0xb   :  { %p3891_p6 = por %p3890_p5, %p3889_p4 }
   0xd   :  { %p3892_p7 = pnand %p3891_p6, %p3885_p3 }
   0xf   :  { %3895 = shalt.err (!%p3892_p7)
}
  0x10   :  { %s3923_s25 = smov 64   ;;  %s3924_s26 = smov 4  }
  0x11   :  { %24 = dma.hbm_to_vmem [thread:$0]  %s4669_s1, 10240, %s19_s16, [#allocation3], %s3923_s25, %s3923_s25, %s3924_s26  }
  0x12   :  { %s3925_s29 = smov [#allocation4]   ;;  %s3896_s7 = scalar_lea.hbm %s4670_s2, 3072 }
  0x13   :  { %s30_s30 = sshll.u32 %s3925_s29, 4  ;;  %p3897_p8 = scmp.ne.s32.totalorder %s4670_s2, %s3896_s7  ;;  %s31_s30 = int_to_ptr.vmem [resolvable:$true] %s30_s30 }
  0x14   :  { %p3900_p9 = scmp.lt.u32.totalorder %s3896_s7, %s4670_s2 }
  0x16   :  { %p3902_p10 = pnand %p3900_p9, %p3897_p8 }
  0x18   :  { %3905 = shalt.err (!%p3902_p10)
}
  0x19   :  { %s3906_s12 = scalar_lea.vmem %s31_s30, 3072  ;;  %p3911_p12 = scmp.lt.s32.totalorder %s31_s30, %s31_s30 }
  0x1a   :  { %p3907_p11 = scmp.ne.s32.totalorder %s31_s30, %s3906_s12  ;;  %p3912_p13 = scmp.lt.s32.totalorder %s3906_s12, %s3906_s12 }
  0x1c   :  { %p3913_p0 = por %p3912_p13, %p3911_p12 }
  0x1e   :  { %p3914_p1 = pnand %p3913_p0, %p3907_p11 }
  0x20   :  { %3917 = shalt.err (!%p3914_p1)
}
  0x21   :  { %36 = dma.hbm_to_vmem [thread:$0]  %s4670_s2, 3072, %s31_s30, [#allocation5], %s3923_s25, %s3923_s25, %s3924_s26  }
  0x22   :  { %3918 = dma.done.wait [#allocation3], 10240  }
  0x23   :  { %3919 = vsyncadd [#allocation3], 4294957056 }
  0x24   :  { %3920 = dma.done.wait [#allocation5], 3072  }
  0x25   :  { %3921 = vsyncadd [#allocation5], 4294964224  ;;  %v3926_v0 = vmov 0   ;;  %v53_v1 = vld [vmem:[%s4668_s0 + $0x10] sm:$0xff]  ;;  %v51_v2 = vld [vmem:[%s4668_s0] sm:$0xff]  ;;  %v49_v25 = vlaneseq }
  0x26   :  { %3668 = vset.pattern.permute.xlu1 %v3926_v0  ;;  %3667 = vset.pattern.permute.xlu0 %v3926_v0  ;;  %v54_v3 = vld [vmem:[%s4668_s0 + $0x18] sm:$0xff]  ;;  %v52_v4 = vld [vmem:[%s4668_s0 + $0x8] sm:$0xff]  ;;  %v55_v6 = vld [vmem:[%s4668_s0 + $0x20] sm:$0xff]  ;;  %v3927_v31 = vmov 1.0|1.0  }
  0x27   :  { %74 = vperm.xlu1 %3668, %v53_v1   ;;  %68 = vperm.xlu0 %3667, %v51_v2   ;;  %v56_v5 = vld [vmem:[%s4668_s0 + $0x28] sm:$0xff]  ;;  %v3669_v7 = vld [vmem:[#allocation2] sm:$0xff]   ;;  %v58_v9 = vld [vmem:[%s4668_s0 + $0x38] sm:$0xff]  ;;  %v50_v28 = vand.u32 127, %v49_v25 }
  0x28   :  { %v3670_v8 = vld [vmem:[#allocation2 + $0x8] sm:$0xff]   ;;  %3165 = vmatprep.subr.bf16.mxu0 %v3669_v7  ;;  %v57_v10 = vld [vmem:[%s4668_s0 + $0x30] sm:$0xff]  ;;  %v59_v13 = vld [vmem:[%s4668_s0 + $0x40] sm:$0xff] }
  0x29   :  { %3166 = vmatpush3.bf16.msra.mxu0 %v3669_v7  ;;  %v3671_v11 = vld [vmem:[#allocation2 + $0x10] sm:$0xff]   ;;  %v60_v12 = vld [vmem:[%s4668_s0 + $0x48] sm:$0xff]  ;;  %v3672_v14 = vld [vmem:[#allocation2 + $0x18] sm:$0xff]  }
  0x2a   :  { %3167 = vmatprep.subr.bf16.mxu0 %v3670_v8  ;;  %v62_v15 = vld [vmem:[%s4668_s0 + $0x58] sm:$0xff]  ;;  %v61_v16 = vld [vmem:[%s4668_s0 + $0x50] sm:$0xff]  ;;  %v3673_v17 = vld [vmem:[#allocation2 + $0x20] sm:$0xff]  }
  0x2b   :  { %77 = vperm.xlu1 %3668, %v54_v3   ;;  %71 = vperm.xlu0 %3667, %v52_v4   ;;  %v64_v18 = vld [vmem:[%s4668_s0 + $0x68] sm:$0xff]  ;;  %v63_v19 = vld [vmem:[%s4668_s0 + $0x60] sm:$0xff]  ;;  %v66_v21 = vld [vmem:[%s4668_s0 + $0x78] sm:$0xff] }
  0x2c   :  { %v3674_v20 = vld [vmem:[#allocation2 + $0x28] sm:$0xff]   ;;  %v65_v22 = vld [vmem:[%s4668_s0 + $0x70] sm:$0xff]  ;;  %v3676_v24 = vld [vmem:[#allocation2 + $0x38] sm:$0xff]  }
  0x2d   :  { %3168 = vmatpush3.bf16.msra.mxu0 %v3670_v8  ;;  %v3675_v23 = vld [vmem:[#allocation2 + $0x30] sm:$0xff]   ;;  %v3677_v44 = vld [vmem:[#allocation4] sm:$0xff]   ;;  %v3686_v46 = vld [vmem:[#allocation2 + $0x48] sm:$0xff]  }
  0x2e   :  { %3169 = vmatprep.subr.bf16.mxu0 %v3671_v11  ;;  %3213 = vmatprep.mubr.bf16.mxu1 %v3677_v44  ;;  %v3685_v45 = vld [vmem:[#allocation2 + $0x40] sm:$0xff]   ;;  %v3687_v47 = vld [vmem:[#allocation2 + $0x50] sm:$0xff]   ;;  %v3688_v48 = vld [vmem:[#allocation2 + $0x58] sm:$0xff]  }
  0x2f   :  { %83 = vperm.xlu1 %3668, %v56_v5   ;;  %80 = vperm.xlu0 %3667, %v55_v6   ;;  %v3689_v49 = vld [vmem:[#allocation2 + $0x60] sm:$0xff]   ;;  %v3690_v50 = vld [vmem:[#allocation2 + $0x68] sm:$0xff]   ;;  %v3691_v51 = vld [vmem:[#allocation2 + $0x70] sm:$0xff]  }
  0x31   :  { %3170 = vmatpush3.bf16.msra.mxu0 %v3671_v11 }
  0x32   :  { %3171 = vmatprep.subr.bf16.mxu0 %v3672_v14 }
  0x33   :  { %89 = vperm.xlu1 %3668, %v58_v9   ;;  %86 = vperm.xlu0 %3667, %v57_v10  }
  0x35   :  { %3172 = vmatpush3.bf16.msra.mxu0 %v3672_v14  ;;  %v3679_v14 = vld [vmem:[#allocation4 + $0x10] sm:$0xff]  }
  0x36   :  { %3173 = vmatprep.subr.bf16.mxu0 %v3673_v17 }
  0x37   :  { %95 = vperm.xlu1 %3668, %v60_v12   ;;  %92 = vperm.xlu0 %3667, %v59_v13   ;;  %v3678_v13 = vld [vmem:[#allocation4 + $0x8] sm:$0xff]  }
  0x39   :  { %3174 = vmatpush3.bf16.msra.mxu0 %v3673_v17  ;;  %v3682_v17 = vld [vmem:[#allocation4 + $0x28] sm:$0xff]  }
  0x3a   :  { %3175 = vmatprep.subr.bf16.mxu0 %v3674_v20 }
  0x3b   :  { %101 = vperm.xlu1 %3668, %v62_v15   ;;  %98 = vperm.xlu0 %3667, %v61_v16   ;;  %v3680_v15 = vld [vmem:[#allocation4 + $0x18] sm:$0xff]   ;;  %v3681_v16 = vld [vmem:[#allocation4 + $0x20] sm:$0xff]  }
  0x3d   :  { %3176 = vmatpush3.bf16.msra.mxu0 %v3674_v20  ;;  %v3692_v20 = vld [vmem:[#allocation2 + $0x78] sm:$0xff]  }
  0x3e   :  { %3177 = vmatprep.subr.bf16.mxu0 %v3675_v23 }
  0x3f   :  { %107 = vperm.xlu1 %3668, %v64_v18   ;;  %104 = vperm.xlu0 %3667, %v63_v19   ;;  %v3683_v18 = vld [vmem:[#allocation4 + $0x30] sm:$0xff]   ;;  %v3684_v19 = vld [vmem:[#allocation4 + $0x38] sm:$0xff]  }
  0x41   :  { %3178 = vmatpush3.bf16.msra.mxu0 %v3675_v23  ;;  %v3695_v23 = vld [vmem:[#allocation2 + $0xd0] sm:$0xff]  }
  0x42   :  { %3179 = vmatprep.subr.bf16.mxu0 %v3676_v24 }
  0x43   :  { %113 = vperm.xlu1 %3668, %v66_v21   ;;  %110 = vperm.xlu0 %3667, %v65_v22   ;;  %v3693_v21 = vld [vmem:[#allocation2 + $0xc0] sm:$0xff]   ;;  %v3694_v22 = vld [vmem:[#allocation2 + $0xc8] sm:$0xff]  }
  0x45   :  { %3180 = vmatpush3.bf16.msra.mxu0 %v3676_v24  ;;  %v3696_v24 = vld [vmem:[#allocation2 + $0xd8] sm:$0xff]  }
  0x46   :  { %3229 = vmatprep.subr.bf16.mxu0 %v3685_v45 }
  0xa6   :  { %v75_v26 = vpop.permute.xlu1 %74  ;;  %v69_v27 = vpop.permute.xlu0 %68 }
  0xa7   :  { %vm117_vm0 = vcmp.eq.s32.totalorder %v50_v28, %v75_v26  ;;  %vm115_vm3 = vcmp.eq.s32.totalorder %v50_v28, %v69_v27  ;;  %v3697_v26 = vld [vmem:[#allocation2 + $0xe0] sm:$0xff]   ;;  %v3698_v27 = vld [vmem:[#allocation2 + $0xe8] sm:$0xff]  }
  0xaa   :  { %v78_v29 = vpop.permute.xlu1 %77  ;;  %v72_v30 = vpop.permute.xlu0 %71 }
  0xab   :  { %vm118_vm1 = vcmp.eq.s32.totalorder %v50_v28, %v78_v29  ;;  %vm116_vm2 = vcmp.eq.s32.totalorder %v50_v28, %v72_v30 }
  0xac   :  { %vm2839_vm4 = vmpackc.low %vm118_vm1, %vm117_vm0 }
  0xad   :  { %vm2837_vm5 = vmpackc.low %vm116_vm2, %vm115_vm3 }
  0xae   :  { %3181 = vmatprep.mubr.msk.bf16.mxu0 %vm2837_vm5, %v3927_v31  ;;  %v84_v32 = vpop.permute.xlu1 %83  ;;  %v81_v33 = vpop.permute.xlu0 %80 }
  0xaf   :  { %vm120_vm6 = vcmp.eq.s32.totalorder %v50_v28, %v84_v32  ;;  %3182 = vmatmul.mubr.msk.bf16.vlgmr.msra.gmra.mrb[0].mxu0 %vm2839_vm4, %v3927_v31  ;;  %vm119_vm7 = vcmp.eq.s32.totalorder %v50_v28, %v81_v33 }
  0xb0   :  { %vm2841_vm8 = vmpackc.low %vm120_vm6, %vm119_vm7  ;;  %3230 = vmatpush3.bf16.msra.mxu0 %v3685_v45 }
  0xb1   :  { %3185 = vmatprep.mubr.msk.bf16.mxu0 %vm2841_vm8, %v3927_v31  ;;  %3231 = vmatprep.subr.bf16.mxu0 %v3686_v46 }
  0xb2   :  { %v90_v34 = vpop.permute.xlu1 %89  ;;  %v87_v35 = vpop.permute.xlu0 %86 }
  0xb3   :  { %vm122_vm9 = vcmp.eq.s32.totalorder %v50_v28, %v90_v34  ;;  %vm121_vm10 = vcmp.eq.s32.totalorder %v50_v28, %v87_v35 }
  0xb4   :  { %vm2843_vm11 = vmpackc.low %vm122_vm9, %vm121_vm10  ;;  %3232 = vmatpush3.bf16.msra.mxu0 %v3686_v46 }
  0xb5   :  { %3233 = vmatprep.subr.bf16.mxu0 %v3687_v47 }
  0xb6   :  { %v96_v36 = vpop.permute.xlu1 %95  ;;  %v93_v37 = vpop.permute.xlu0 %92 }
  0xb7   :  { %vm124_vm12 = vcmp.eq.s32.totalorder %v50_v28, %v96_v36  ;;  %3186 = vmatmul.mubr.msk.bf16.gmra.mrb[4].mxu0 %vm2843_vm11, %v3927_v31  ;;  %vm123_vm13 = vcmp.eq.s32.totalorder %v50_v28, %v93_v37 }
  0xb8   :  { %vm2845_vm14 = vmpackc.low %vm124_vm12, %vm123_vm13  ;;  %3234 = vmatpush3.bf16.msra.mxu0 %v3687_v47 }
  0xb9   :  { %3189 = vmatprep.mubr.msk.bf16.mxu0 %vm2845_vm14, %v3927_v31  ;;  %3235 = vmatprep.subr.bf16.mxu0 %v3688_v48 }
  0xba   :  { %v102_v38 = vpop.permute.xlu1 %101  ;;  %v99_v39 = vpop.permute.xlu0 %98 }
  0xbb   :  { %vm126_vm15 = vcmp.eq.s32.totalorder %v50_v28, %v102_v38  ;;  %vm125_vm0 = vcmp.eq.s32.totalorder %v50_v28, %v99_v39 }
  0xbc   :  { %vm2847_vm1 = vmpackc.low %vm126_vm15, %vm125_vm0  ;;  %3236 = vmatpush3.bf16.msra.mxu0 %v3688_v48 }
  0xbd   :  { %3237 = vmatprep.subr.bf16.mxu0 %v3689_v49 }
  0xbe   :  { %v108_v40 = vpop.permute.xlu1 %107  ;;  %v105_v41 = vpop.permute.xlu0 %104 }
  0xbf   :  { %vm128_vm2 = vcmp.eq.s32.totalorder %v50_v28, %v108_v40  ;;  %3190 = vmatmul.mubr.msk.bf16.gmra.mrb[8].mxu0 %vm2847_vm1, %v3927_v31  ;;  %vm127_vm3 = vcmp.eq.s32.totalorder %v50_v28, %v105_v41 }
  0xc0   :  { %vm2849_vm4 = vmpackc.low %vm128_vm2, %vm127_vm3  ;;  %3238 = vmatpush3.bf16.msra.mxu0 %v3689_v49 }
  0xc1   :  { %3193 = vmatprep.mubr.msk.bf16.mxu0 %vm2849_vm4, %v3927_v31  ;;  %3239 = vmatprep.subr.bf16.mxu0 %v3690_v50 }
  0xc2   :  { %v114_v42 = vpop.permute.xlu1 %113  ;;  %v111_v43 = vpop.permute.xlu0 %110 }
  0xc3   :  { %vm130_vm5 = vcmp.eq.s32.totalorder %v50_v28, %v114_v42  ;;  %vm129_vm6 = vcmp.eq.s32.totalorder %v50_v28, %v111_v43 }
  0xc4   :  { %vm2851_vm7 = vmpackc.low %vm130_vm5, %vm129_vm6  ;;  %3240 = vmatpush3.bf16.msra.mxu0 %v3690_v50 }
  0xc5   :  { %3241 = vmatprep.subr.bf16.mxu0 %v3691_v51 }
  0xc7   :  { %3194 = vmatmul.mubr.msk.bf16.gmra.mrb[12].mxu0 %vm2851_vm7, %v3927_v31 }
  0xc8   :  { %3242 = vmatpush3.bf16.msra.mxu0 %v3691_v51 }
  0xc9   :  { %3243 = vmatprep.subr.bf16.mxu0 %v3692_v20 }
  0xcc   :  { %3244 = vmatpush3.bf16.msra.mxu0 %v3692_v20 }
 0x182   :  { %v3183_v52 = vpop.f32.mrb[0].mxu0 }
 0x183   :  { %v269_v53 = vpop.f32.mrb[1].mxu0 }
 0x184   :  { %v3184_v54 = vpop.f32.mrb[2].mxu0 }
 0x185   :  { %v4032_v55 = vpack.c.bf16 %v3184_v54, %v3183_v52  ;;  %v272_v56 = vpop.f32.mrb[3].mxu0  ;;  %v3699_v52 = vld [vmem:[#allocation2 + $0xf0] sm:$0xff]   ;;  %v3701_v54 = vld [vmem:[#allocation2 + $0x100] sm:$0xff]  }
 0x186   :  { %v4034_v57 = vpack.c.bf16 %v272_v56, %v269_v53  ;;  %v3700_v53 = vld [vmem:[#allocation2 + $0xf8] sm:$0xff]   ;;  %v4065_v56 = vshrl.u32 %v49_v25, 7 }
 0x188   :  { %3197 = vmatprep.subr.bf16.mxu1 %v4034_v57 }
 0x189   :  { %3198 = vmatpush3.bf16.msra.mxu1 %v4034_v57 }
 0x18a   :  { %v3187_v58 = vpop.f32.mrb[4].mxu0  ;;  %3199 = vmatprep.subr.bf16.mxu1 %v4032_v55 }
 0x18b   :  { %v285_v59 = vpop.f32.mrb[5].mxu0 }
 0x18c   :  { %v3188_v60 = vpop.f32.mrb[6].mxu0 }
 0x18d   :  { %v4039_v61 = vpack.c.bf16 %v3188_v60, %v3187_v58  ;;  %v288_v62 = vpop.f32.mrb[7].mxu0  ;;  %3200 = vmatpush3.bf16.msra.mxu1 %v4032_v55  ;;  %v528_v58 = vsub.s32 0, %v4065_v56 }
 0x18e   :  { %v4042_v63 = vpack.c.bf16 %v288_v62, %v285_v59  ;;  %v4071_v59 = vld [vmem:[%s4671_s3] sm:$0xff] }
 0x18f   :  { %v4074_v60 = vrot.slane %v4071_v59, %v528_v58 }
 0x190   :  { %3201 = vmatprep.subr.bf16.mxu1 %v4042_v63 }
 0x191   :  { %3202 = vmatpush3.bf16.msra.mxu1 %v4042_v63 }
 0x192   :  { %v3191_v1 = vpop.f32.mrb[8].mxu0  ;;  %3203 = vmatprep.subr.bf16.mxu1 %v4039_v61 }
 0x193   :  { %v301_v2 = vpop.f32.mrb[9].mxu0 }
 0x194   :  { %v3192_v3 = vpop.f32.mrb[10].mxu0 }
 0x195   :  { %v4047_v4 = vpack.c.bf16 %v3192_v3, %v3191_v1  ;;  %v304_v5 = vpop.f32.mrb[11].mxu0  ;;  %3204 = vmatpush3.bf16.msra.mxu1 %v4039_v61 }
 0x196   :  { %v4050_v6 = vpack.c.bf16 %v304_v5, %v301_v2 }
 0x198   :  { %3205 = vmatprep.subr.bf16.mxu1 %v4050_v6 }
 0x199   :  { %3206 = vmatpush3.bf16.msra.mxu1 %v4050_v6 }
 0x19a   :  { %v3195_v7 = vpop.f32.mrb[12].mxu0  ;;  %3207 = vmatprep.subr.bf16.mxu1 %v4047_v4 }
 0x19b   :  { %v317_v8 = vpop.f32.mrb[13].mxu0 }
 0x19c   :  { %v3196_v9 = vpop.f32.mrb[14].mxu0 }
 0x19d   :  { %v4055_v10 = vpack.c.bf16 %v3196_v9, %v3195_v7  ;;  %v320_v11 = vpop.f32.mrb[15].mxu0  ;;  %3208 = vmatpush3.bf16.msra.mxu1 %v4047_v4 }
 0x19e   :  { %v4058_v12 = vpack.c.bf16 %v320_v11, %v317_v8 }
 0x1a0   :  { %3209 = vmatprep.subr.bf16.mxu1 %v4058_v12 }
 0x1a1   :  { %3210 = vmatpush3.bf16.msra.mxu1 %v4058_v12 }
 0x1a2   :  { %3211 = vmatprep.subr.bf16.mxu1 %v4055_v10 }
 0x1a5   :  { %3212 = vmatpush3.bf16.msra.mxu1 %v4055_v10 }
 0x1a6   :  { %3261 = vmatprep.subr.bf16.mxu1 %v3693_v21 }
 0x1a8   :  { %3214 = vmatmul.mubr.bf16.vlgmr.msra.gmra.mrb[0].mxu1 %v3678_v13 }
 0x1a9   :  { %3217 = vmatprep.mubr.bf16.mxu1 %v3679_v14  ;;  %3262 = vmatpush3.bf16.msra.mxu1 %v3693_v21 }
 0x1aa   :  { %3263 = vmatprep.subr.bf16.mxu1 %v3694_v22 }
 0x1ad   :  { %3264 = vmatpush3.bf16.msra.mxu1 %v3694_v22 }
 0x1ae   :  { %3265 = vmatprep.subr.bf16.mxu1 %v3695_v23 }
 0x1b0   :  { %3218 = vmatmul.mubr.bf16.gmra.mrb[4].mxu1 %v3680_v15 }
 0x1b1   :  { %3221 = vmatprep.mubr.bf16.mxu1 %v3681_v16  ;;  %3266 = vmatpush3.bf16.msra.mxu1 %v3695_v23 }
 0x1b2   :  { %3267 = vmatprep.subr.bf16.mxu1 %v3696_v24 }
 0x1b5   :  { %3268 = vmatpush3.bf16.msra.mxu1 %v3696_v24 }
 0x1b6   :  { %3269 = vmatprep.subr.bf16.mxu1 %v3697_v26 }
 0x1b8   :  { %3222 = vmatmul.mubr.bf16.gmra.mrb[8].mxu1 %v3682_v17 }
 0x1b9   :  { %3225 = vmatprep.mubr.bf16.mxu1 %v3683_v18  ;;  %3270 = vmatpush3.bf16.msra.mxu1 %v3697_v26 }
 0x1ba   :  { %3271 = vmatprep.subr.bf16.mxu1 %v3698_v27 }
 0x1bd   :  { %3272 = vmatpush3.bf16.msra.mxu1 %v3698_v27 }
 0x1be   :  { %3273 = vmatprep.subr.bf16.mxu1 %v3699_v52 }
 0x1c0   :  { %3226 = vmatmul.mubr.bf16.gmra.mrb[12].mxu1 %v3684_v19  ;;  %v3702_v19 = vld [vmem:[#allocation2 + $0x108] sm:$0xff]  }
 0x1c1   :  { %3274 = vmatpush3.bf16.msra.mxu1 %v3699_v52  ;;  %v3706_v52 = vld [vmem:[#allocation2 + $0x128] sm:$0xff]  }
 0x1c2   :  { %3275 = vmatprep.subr.bf16.mxu1 %v3700_v53 }
 0x1c5   :  { %3276 = vmatpush3.bf16.msra.mxu1 %v3700_v53 }
 0x1c6   :  { %3357 = vmatprep.subr.bf16.mxu1 %v3701_v54 }
 0x27b   :  { %v3215_v28 = vpop.f32.mrb[0].mxu1 }
 0x27c   :  { %v438_v29 = vpop.f32.mrb[1].mxu1 }
 0x27d   :  { %v3216_v30 = vpop.f32.mrb[2].mxu1 }
 0x27e   :  { %v502_v31 = vpack.c.bf16 %v3216_v30, %v3215_v28  ;;  %v441_v32 = vpop.f32.mrb[3].mxu1  ;;  %v3703_v28 = vld [vmem:[#allocation2 + $0x110] sm:$0xff]  }
 0x27f   :  { %v501_v33 = vpack.c.bf16 %v441_v32, %v438_v29 }
 0x281   :  { %3245 = vmatprep.mubr.bf16.mxu0 %v501_v33 }
 0x282   :  { %3246 = vmatmul.mubr.bf16.vlgmr.msra.gmra.mrb[16].mxu0 %v502_v31 }
 0x283   :  { %v3219_v34 = vpop.f32.mrb[4].mxu1 }
 0x284   :  { %v454_v35 = vpop.f32.mrb[5].mxu1 }
 0x285   :  { %v3220_v36 = vpop.f32.mrb[6].mxu1 }
 0x286   :  { %v504_v37 = vpack.c.bf16 %v3220_v36, %v3219_v34  ;;  %v457_v38 = vpop.f32.mrb[7].mxu1  ;;  %v3704_v36 = vld [vmem:[#allocation2 + $0x118] sm:$0xff]  }
 0x287   :  { %v503_v39 = vpack.c.bf16 %v457_v38, %v454_v35 }
 0x289   :  { %3249 = vmatprep.mubr.bf16.mxu0 %v503_v39 }
 0x28a   :  { %3250 = vmatmul.mubr.bf16.gmra.mrb[20].mxu0 %v504_v37 }
 0x28b   :  { %v3223_v40 = vpop.f32.mrb[8].mxu1 }
 0x28c   :  { %v470_v41 = vpop.f32.mrb[9].mxu1 }
 0x28d   :  { %v3224_v42 = vpop.f32.mrb[10].mxu1 }
 0x28e   :  { %v506_v43 = vpack.c.bf16 %v3224_v42, %v3223_v40  ;;  %v473_v44 = vpop.f32.mrb[11].mxu1 }
 0x28f   :  { %v505_v45 = vpack.c.bf16 %v473_v44, %v470_v41  ;;  %v3705_v44 = vld [vmem:[#allocation2 + $0x120] sm:$0xff]  }
 0x291   :  { %3253 = vmatprep.mubr.bf16.mxu0 %v505_v45 }
 0x292   :  { %3254 = vmatmul.mubr.bf16.gmra.mrb[24].mxu0 %v506_v43 }
 0x293   :  { %v3227_v46 = vpop.f32.mrb[12].mxu1 }
 0x294   :  { %v486_v47 = vpop.f32.mrb[13].mxu1 }
 0x295   :  { %v3228_v48 = vpop.f32.mrb[14].mxu1 }
 0x296   :  { %v508_v49 = vpack.c.bf16 %v3228_v48, %v3227_v46  ;;  %v489_v50 = vpop.f32.mrb[15].mxu1 }
 0x297   :  { %v507_v51 = vpack.c.bf16 %v489_v50, %v486_v47 }
 0x299   :  { %3257 = vmatprep.mubr.bf16.mxu0 %v507_v51 }
 0x29a   :  { %3258 = vmatmul.mubr.bf16.gmra.mrb[28].mxu0 %v508_v49 }
 0x355   :  { %v3247_v62 = vpop.f32.mrb[16].mxu0 }
 0x356   :  { %v612_v1 = vpop.f32.mrb[17].mxu0  ;;  %v4080_v5 = vadd.f32 %v3247_v62, %v4074_v60 }
 0x357   :  { %v4077_v2 = vadd.f32 %v612_v1, %v4074_v60  ;;  %v3248_v3 = vpop.f32.mrb[18].mxu0 }
 0x358   :  { %v4083_v25 = vadd.f32 %v3248_v3, %v4074_v60  ;;  %v615_v7 = vpop.f32.mrb[19].mxu0  ;;  %v677_v14 = vmax.f32 %v4080_v5, 0.0 }
 0x359   :  { %v4086_v8 = vadd.f32 %v615_v7, %v4074_v60  ;;  %v675_v11 = vmax.f32 %v4077_v2, 0.0 }
 0x35a   :  { %v678_v9 = vmax.f32 %v4083_v25, 0.0 }
 0x35b   :  { %v676_v13 = vmax.f32 %v4086_v8, 0.0 }
 0x35c   :  { %v4102_v17 = vpack.c.bf16 %v678_v9, %v677_v14 }
 0x35d   :  { %v4096_v15 = vpack.c.bf16 %v676_v13, %v675_v11  ;;  %v3251_v16 = vpop.f32.mrb[20].mxu0 }
 0x35e   :  { %v628_v18 = vpop.f32.mrb[21].mxu0  ;;  %v4109_v22 = vadd.f32 %v3251_v16, %v4074_v60  ;;  %v3707_v16 = vld [vmem:[#allocation2 + $0x130] sm:$0xff]  }
 0x35f   :  { %v4105_v20 = vadd.f32 %v628_v18, %v4074_v60  ;;  %v3252_v21 = vpop.f32.mrb[22].mxu0  ;;  %3277 = vmatprep.mubr.bf16.mxu1 %v4096_v15 }
 0x360   :  { %v4112_v23 = vadd.f32 %v3252_v21, %v4074_v60  ;;  %v631_v24 = vpop.f32.mrb[23].mxu0  ;;  %3278 = vmatmul.mubr.bf16.vlgmr.msra.gmra.mrb[16].mxu1 %v4102_v17  ;;  %v681_v31 = vmax.f32 %v4109_v22, 0.0 }
 0x361   :  { %v4116_v26 = vadd.f32 %v631_v24, %v4074_v60  ;;  %3358 = vmatpush3.bf16.msra.mxu1 %v3701_v54  ;;  %v679_v29 = vmax.f32 %v4105_v20, 0.0 }
 0x362   :  { %v682_v27 = vmax.f32 %v4112_v23, 0.0  ;;  %3359 = vmatprep.subr.bf16.mxu1 %v3702_v19 }
 0x363   :  { %v680_v30 = vmax.f32 %v4116_v26, 0.0 }
 0x364   :  { %v694_v34 = vpack.c.bf16 %v682_v27, %v681_v31 }
 0x365   :  { %v693_v32 = vpack.c.bf16 %v680_v30, %v679_v29  ;;  %v3255_v33 = vpop.f32.mrb[24].mxu0  ;;  %3360 = vmatpush3.bf16.msra.mxu1 %v3702_v19 }
 0x366   :  { %v644_v35 = vpop.f32.mrb[25].mxu0  ;;  %3361 = vmatprep.subr.bf16.mxu1 %v3703_v28  ;;  %v4134_v39 = vadd.f32 %v3255_v33, %v4074_v60  ;;  %v3709_v33 = vld [vmem:[#allocation4 + $0x40] sm:$0xff]  }
 0x367   :  { %v4131_v37 = vadd.f32 %v644_v35, %v4074_v60  ;;  %v3256_v38 = vpop.f32.mrb[26].mxu0  ;;  %3281 = vmatprep.mubr.bf16.mxu1 %v693_v32  ;;  %3309 = vmatprep.mubr.bf16.mxu0 %v3709_v33 }
 0x368   :  { %v4137_v40 = vadd.f32 %v3256_v38, %v4074_v60  ;;  %v647_v41 = vpop.f32.mrb[27].mxu0  ;;  %3282 = vmatmul.mubr.bf16.gmra.mrb[20].mxu1 %v694_v34  ;;  %v4677_v47 = vmax.f32 %v4134_v39, 0.0  ;;  %v4684_v8 = vmax.f32 %v4134_v39, 0.0 }
 0x369   :  { %v4140_v42 = vadd.f32 %v647_v41, %v4074_v60  ;;  %3362 = vmatpush3.bf16.msra.mxu1 %v3703_v28  ;;  %v4679_v45 = vmax.f32 %v4131_v37, 0.0  ;;  %v3708_v28 = vld [vmem:[#allocation2 + $0x138] sm:$0xff]   ;;  %v4682_v5 = vmax.f32 %v4131_v37, 0.0 }
 0x36a   :  { %v4678_v43 = vmax.f32 %v4137_v40, 0.0  ;;  %3363 = vmatprep.subr.bf16.mxu1 %v3704_v36  ;;  %v4683_v25 = vmax.f32 %v4137_v40, 0.0 }
 0x36b   :  { %v4680_v46 = vmax.f32 %v4140_v42, 0.0  ;;  %v4681_v2 = vmax.f32 %v4140_v42, 0.0 }
 0x36c   :  { %v696_v50 = vpack.c.bf16 %v4678_v43, %v4677_v47 }
 0x36d   :  { %v695_v48 = vpack.c.bf16 %v4680_v46, %v4679_v45  ;;  %v3259_v49 = vpop.f32.mrb[28].mxu0  ;;  %3364 = vmatpush3.bf16.msra.mxu1 %v3704_v36 }
 0x36e   :  { %v660_v51 = vpop.f32.mrb[29].mxu0  ;;  %3365 = vmatprep.subr.bf16.mxu1 %v3705_v44  ;;  %v4158_v58 = vadd.f32 %v3259_v49, %v4074_v60 }
 0x36f   :  { %v4155_v53 = vadd.f32 %v660_v51, %v4074_v60  ;;  %v3260_v54 = vpop.f32.mrb[30].mxu0  ;;  %3285 = vmatprep.mubr.bf16.mxu1 %v695_v48 }
 0x370   :  { %v4161_v62 = vadd.f32 %v3260_v54, %v4074_v60  ;;  %v663_v1 = vpop.f32.mrb[31].mxu0  ;;  %3286 = vmatmul.mubr.bf16.gmra.mrb[24].mxu1 %v696_v50  ;;  %v4673_v21 = vmax.f32 %v4158_v58, 0.0  ;;  %v4688_v20 = vmax.f32 %v4158_v58, 0.0 }
 0x371   :  { %v4164_v3 = vadd.f32 %v663_v1, %v4074_v60  ;;  %3366 = vmatpush3.bf16.msra.mxu1 %v3705_v44  ;;  %v4675_v18 = vmax.f32 %v4155_v53, 0.0 }
 0x372   :  { %v4674_v7 = vmax.f32 %v4161_v62, 0.0  ;;  %3367 = vmatprep.subr.bf16.mxu1 %v3706_v52 }
 0x373   :  { %v4676_v19 = vmax.f32 %v4164_v3, 0.0 }
 0x374   :  { %v698_v60 = vpack.c.bf16 %v4674_v7, %v4673_v21  ;;  %v3723_v21 = vld [vmem:[#allocation2 + $0xb0] sm:$0xff]  }
 0x375   :  { %v697_v24 = vpack.c.bf16 %v4676_v19, %v4675_v18  ;;  %3368 = vmatpush3.bf16.msra.mxu1 %v3706_v52 }
 0x376   :  { %3369 = vmatprep.subr.bf16.mxu1 %v3707_v16 }
 0x377   :  { %3289 = vmatprep.mubr.bf16.mxu1 %v697_v24 }
 0x378   :  { %3290 = vmatmul.mubr.bf16.gmra.mrb[28].mxu1 %v698_v60 }
 0x379   :  { %3370 = vmatpush3.bf16.msra.mxu1 %v3707_v16  ;;  %3373 = vmatprep.mubr.bf16.mxu1 %v4096_v15 }
 0x37a   :  { %3371 = vmatprep.subr.bf16.mxu1 %v3708_v28 }
 0x37d   :  { %3372 = vmatpush3.bf16.msra.mxu1 %v3708_v28 }
 0x380   :  { %3374 = vmatmul.mubr.bf16.vlgmr.msra.gmra.mrb[32].mxu1 %v4102_v17 }
 0x381   :  { %3377 = vmatprep.mubr.bf16.mxu1 %v693_v32 }
 0x388   :  { %3378 = vmatmul.mubr.bf16.gmra.mrb[36].mxu1 %v694_v34 }
 0x389   :  { %3381 = vmatprep.mubr.bf16.mxu1 %v695_v48 }
 0x390   :  { %3382 = vmatmul.mubr.bf16.gmra.mrb[40].mxu1 %v696_v50 }
 0x391   :  { %3385 = vmatprep.mubr.bf16.mxu1 %v697_v24 }
 0x398   :  { %3386 = vmatmul.mubr.bf16.gmra.mrb[44].mxu1 %v698_v60 }
 0x433   :  { %v3279_v35 = vpop.f32.mrb[16].mxu1 }
 0x434   :  { %v815_v36 = vpop.f32.mrb[17].mxu1 }
 0x435   :  { %v3280_v38 = vpop.f32.mrb[18].mxu1 }
 0x436   :  { %v879_v41 = vpack.c.bf16 %v3280_v38, %v3279_v35  ;;  %v818_v44 = vpop.f32.mrb[19].mxu1 }
 0x437   :  { %v878_v49 = vpack.c.bf16 %v818_v44, %v815_v36  ;;  %v3711_v44 = vld [vmem:[#allocation2 + $0x80] sm:$0xff]  }
 0x439   :  { %3293 = vmatprep.subr.bf16.mxu0 %v878_v49 }
 0x43a   :  { %3294 = vmatpush3.bf16.msra.mxu0 %v878_v49 }
 0x43b   :  { %v3283_v15 = vpop.f32.mrb[20].mxu1  ;;  %3295 = vmatprep.subr.bf16.mxu0 %v879_v41 }
 0x43c   :  { %v831_v51 = vpop.f32.mrb[21].mxu1 }
 0x43d   :  { %v3284_v17 = vpop.f32.mrb[22].mxu1 }
 0x43e   :  { %v881_v32 = vpack.c.bf16 %v3284_v17, %v3283_v15  ;;  %v834_v34 = vpop.f32.mrb[23].mxu1  ;;  %3296 = vmatpush3.bf16.msra.mxu0 %v879_v41 }
 0x43f   :  { %v880_v48 = vpack.c.bf16 %v834_v34, %v831_v51  ;;  %v3710_v51 = vld [vmem:[#allocation4 + $0x48] sm:$0xff]   ;;  %v3713_v34 = vld [vmem:[#allocation4 + $0x50] sm:$0xff]  }
 0x441   :  { %3297 = vmatprep.subr.bf16.mxu0 %v880_v48 }
 0x442   :  { %3298 = vmatpush3.bf16.msra.mxu0 %v880_v48 }
 0x443   :  { %v3287_v50 = vpop.f32.mrb[24].mxu1  ;;  %3299 = vmatprep.subr.bf16.mxu0 %v881_v32 }
 0x444   :  { %v847_v52 = vpop.f32.mrb[25].mxu1 }
 0x445   :  { %v3288_v54 = vpop.f32.mrb[26].mxu1 }
 0x446   :  { %v883_v1 = vpack.c.bf16 %v3288_v54, %v3287_v50  ;;  %v850_v16 = vpop.f32.mrb[27].mxu1  ;;  %3300 = vmatpush3.bf16.msra.mxu0 %v881_v32  ;;  %v3712_v50 = vld [vmem:[#allocation2 + $0x88] sm:$0xff]   ;;  %v3715_v54 = vld [vmem:[#allocation2 + $0x90] sm:$0xff]  }
 0x447   :  { %v882_v24 = vpack.c.bf16 %v850_v16, %v847_v52 }
 0x449   :  { %3301 = vmatprep.subr.bf16.mxu0 %v882_v24 }
 0x44a   :  { %3302 = vmatpush3.bf16.msra.mxu0 %v882_v24  ;;  %v3714_v24 = vld [vmem:[#allocation4 + $0x58] sm:$0xff]  }
 0x44b   :  { %v3291_v60 = vpop.f32.mrb[28].mxu1  ;;  %3303 = vmatprep.subr.bf16.mxu0 %v883_v1 }
 0x44c   :  { %v863_v28 = vpop.f32.mrb[29].mxu1 }
 0x44d   :  { %v3292_v33 = vpop.f32.mrb[30].mxu1 }
 0x44e   :  { %v885_v35 = vpack.c.bf16 %v3292_v33, %v3291_v60  ;;  %v866_v36 = vpop.f32.mrb[31].mxu1  ;;  %3304 = vmatpush3.bf16.msra.mxu0 %v883_v1  ;;  %v3717_v33 = vld [vmem:[#allocation4 + $0x60] sm:$0xff]  }
 0x44f   :  { %v884_v38 = vpack.c.bf16 %v866_v36, %v863_v28  ;;  %v3716_v36 = vld [vmem:[#allocation2 + $0x98] sm:$0xff]  }
 0x451   :  { %3305 = vmatprep.subr.bf16.mxu0 %v884_v38 }
 0x452   :  { %3306 = vmatpush3.bf16.msra.mxu0 %v884_v38 }
 0x453   :  { %3307 = vmatprep.subr.bf16.mxu0 %v885_v35  ;;  %v4180_v41 = vpop.f32.mrb[32].mxu1 }
 0x454   :  { %v1336_v49 = vpop.f32.mrb[33].mxu1 }
 0x455   :  { %v4182_v15 = vpop.f32.mrb[34].mxu1 }
 0x456   :  { %v1400_v17 = vpack.c.bf16 %v4182_v15, %v4180_v41  ;;  %3308 = vmatpush3.bf16.msra.mxu0 %v885_v35  ;;  %v1339_v32 = vpop.f32.mrb[35].mxu1  ;;  %v1505_v41 = vld [vmem:[#allocation4 + $0x80] sm:$0xf]  ;;  %v1506_v15 = vld [vmem:[#allocation4 + $0x84] sm:$0xf] }
 0x457   :  { %v1399_v48 = vpack.c.bf16 %v1339_v32, %v1336_v49  ;;  %3325 = vmatprep.subr.bf16.mxu0 %v3711_v44  ;;  %v3718_v32 = vld [vmem:[#allocation4 + $0x68] sm:$0xff]   ;;  %vm1521_vm8 = vcmp.gt.bf16.partialorder %v1505_v41, 0  ;;  %vm1522_vm9 = vcmp.gt.bf16.partialorder %v1506_v15, 0 }
 0x459   :  { %3310 = vmatmul.mubr.bf16.vlgmr.msra.gmra.mrb[32].mxu0 %v3710_v51  ;;  %3405 = vmatprep.mubr.bf16.mxu1 %v1399_v48 }
 0x45a   :  { %3326 = vmatpush3.bf16.msra.mxu0 %v3711_v44  ;;  %3313 = vmatprep.mubr.bf16.mxu0 %v3713_v34  ;;  %v3719_v44 = vld [vmem:[#allocation2 + $0xa0] sm:$0xff]  }
 0x45b   :  { %v4186_v52 = vpop.f32.mrb[36].mxu1  ;;  %3327 = vmatprep.subr.bf16.mxu0 %v3712_v50 }
 0x45c   :  { %v4188_v1 = vpop.f32.mrb[37].mxu1 }
 0x45d   :  { %v4190_v16 = vpop.f32.mrb[38].mxu1 }
 0x45e   :  { %v1402_v60 = vpack.c.bf16 %v4190_v16, %v4186_v52  ;;  %3328 = vmatpush3.bf16.msra.mxu0 %v3712_v50  ;;  %v4194_v28 = vpop.f32.mrb[39].mxu1  ;;  %v3721_v50 = vld [vmem:[#allocation4 + $0x70] sm:$0xff]   ;;  %v1537_v52 = vsel %vm1521_vm8, 65537, %v3926_v0  ;;  %v1508_v16 = vld [vmem:[#allocation4 + $0x8c] sm:$0xf] }
 0x45f   :  { %v1401_v35 = vpack.c.bf16 %v4194_v28, %v4188_v1  ;;  %3329 = vmatprep.subr.bf16.mxu0 %v3715_v54  ;;  %v1538_v1 = vsel %vm1522_vm9, 65537, %v3926_v0  ;;  %v1553_v28 = vunpack.c.l.b16 %v1537_v52  ;;  %vm1524_vm11 = vcmp.gt.bf16.partialorder %v1508_v16, 0 }
 0x461   :  { %3314 = vmatmul.mubr.bf16.gmra.mrb[36].mxu0 %v3714_v24  ;;  %v3720_v24 = vld [vmem:[#allocation2 + $0xa8] sm:$0xff]   ;;  %vm1569_vm13 = vcmp.ne.s32.totalorder %v1553_v28, 0 }
 0x462   :  { %3330 = vmatpush3.bf16.msra.mxu0 %v3715_v54  ;;  %3317 = vmatprep.mubr.bf16.mxu0 %v3717_v33 }
 0x463   :  { %v4198_v38 = vpop.f32.mrb[40].mxu1  ;;  %3331 = vmatprep.subr.bf16.mxu0 %v3716_v36 }
 0x464   :  { %v4200_v49 = vpop.f32.mrb[41].mxu1 }
 0x465   :  { %v4202_v51 = vpop.f32.mrb[42].mxu1 }
 0x466   :  { %v1404_v34 = vpack.c.bf16 %v4202_v51, %v4198_v38  ;;  %3332 = vmatpush3.bf16.msra.mxu0 %v3716_v36  ;;  %v4206_v48 = vpop.f32.mrb[43].mxu1  ;;  %v3722_v36 = vld [vmem:[#allocation4 + $0x78] sm:$0xff]  }
 0x467   :  { %v1403_v54 = vpack.c.bf16 %v4206_v48, %v4200_v49  ;;  %3333 = vmatprep.subr.bf16.mxu0 %v3719_v44  ;;  %v1540_v49 = vsel %vm1524_vm11, 65537, %v3926_v0  ;;  %v1512_v48 = vld [vmem:[#allocation4 + $0x9c] sm:$0xf] }
 0x468   :  { %vm1528_vm2 = vcmp.gt.bf16.partialorder %v1512_v48, 0 }
 0x469   :  { %3318 = vmatmul.mubr.bf16.gmra.mrb[40].mxu0 %v3718_v32 }
 0x46a   :  { %3334 = vmatpush3.bf16.msra.mxu0 %v3719_v44  ;;  %3321 = vmatprep.mubr.bf16.mxu0 %v3721_v50  ;;  %v3724_v44 = vld [vmem:[#allocation2 + $0xb8] sm:$0xff]  }
 0x46b   :  { %v4210_v33 = vpop.f32.mrb[44].mxu1  ;;  %3335 = vmatprep.subr.bf16.mxu0 %v3720_v24 }
 0x46c   :  { %v4212_v7 = vpop.f32.mrb[45].mxu1 }
 0x46d   :  { %v4214_v18 = vpop.f32.mrb[46].mxu1 }
 0x46e   :  { %v1406_v19 = vpack.c.bf16 %v4214_v18, %v4210_v33  ;;  %3336 = vmatpush3.bf16.msra.mxu0 %v3720_v24  ;;  %v4218_v47 = vpop.f32.mrb[47].mxu1  ;;  %v1511_v18 = vld [vmem:[#allocation4 + $0x98] sm:$0xf] }
 0x46f   :  { %v1405_v32 = vpack.c.bf16 %v4218_v47, %v4212_v7  ;;  %3337 = vmatprep.subr.bf16.mxu0 %v3723_v21  ;;  %v1554_v7 = vunpack.c.l.b16 %v1538_v1  ;;  %vm1527_vm15 = vcmp.gt.bf16.partialorder %v1511_v18, 0 }
 0x471   :  { %3322 = vmatmul.mubr.bf16.gmra.mrb[44].mxu0 %v3722_v36  ;;  %vm1570_vm14 = vcmp.ne.s32.totalorder %v1554_v7, 0 }
 0x472   :  { %3338 = vmatpush3.bf16.msra.mxu0 %v3723_v21  ;;  %3341 = vmatprep.mubr.bf16.mxu0 %v4034_v57  ;;  %v1195_v21 = vsub.s32 1, %v4065_v56 }
 0x473   :  { %3339 = vmatprep.subr.bf16.mxu0 %v3724_v44 }
 0x474   :  { %v4232_v57 = vrot.slane %v4071_v59, %v1195_v21 }
 0x476   :  { %3340 = vmatpush3.bf16.msra.mxu0 %v3724_v44 }
 0x479   :  { %3342 = vmatmul.mubr.bf16.vlgmr.msra.gmra.mrb[32].mxu0 %v4032_v55 }
 0x47a   :  { %3345 = vmatprep.mubr.bf16.mxu0 %v4042_v63 }
 0x481   :  { %3346 = vmatmul.mubr.bf16.gmra.mrb[36].mxu0 %v4039_v61 }
 0x482   :  { %3349 = vmatprep.mubr.bf16.mxu0 %v4050_v6 }
 0x489   :  { %3350 = vmatmul.mubr.bf16.gmra.mrb[40].mxu0 %v4047_v4 }
 0x48a   :  { %3353 = vmatprep.mubr.bf16.mxu0 %v4058_v12 }
 0x491   :  { %3354 = vmatmul.mubr.bf16.gmra.mrb[44].mxu0 %v4055_v10 }
 0x54c   :  { %v3343_v50 = vpop.f32.mrb[32].mxu0 }
 0x54d   :  { %v1199_v55 = vadd.f32 %v3343_v50, %v4232_v57  ;;  %v1130_v24 = vpop.f32.mrb[33].mxu0 }
 0x54e   :  { %v1197_v63 = vadd.f32 %v4232_v57, %v1130_v24  ;;  %v3344_v61 = vpop.f32.mrb[34].mxu0 }
 0x54f   :  { %3765 = vtanh.f32 %v1199_v55  ;;  %v1200_v6 = vadd.f32 %v3344_v61, %v4232_v57  ;;  %v1133_v4 = vpop.f32.mrb[35].mxu0 }
 0x550   :  { %3767 = vtanh.f32 %v1197_v63  ;;  %v1198_v12 = vadd.f32 %v4232_v57, %v1133_v4 }
 0x551   :  { %3769 = vtanh.f32 %v1200_v6 }
 0x552   :  { %3771 = vtanh.f32 %v1198_v12 }
 0x554   :  { %v3347_v10 = vpop.f32.mrb[36].mxu0 }
 0x555   :  { %v1203_v59 = vadd.f32 %v3347_v10, %v4232_v57  ;;  %v1146_v36 = vpop.f32.mrb[37].mxu0 }
 0x556   :  { %v1201_v44 = vadd.f32 %v4232_v57, %v1146_v36  ;;  %v3348_v21 = vpop.f32.mrb[38].mxu0 }
 0x557   :  { %3773 = vtanh.f32 %v1203_v59  ;;  %v1204_v50 = vadd.f32 %v3348_v21, %v4232_v57  ;;  %v1149_v24 = vpop.f32.mrb[39].mxu0 }
 0x558   :  { %3775 = vtanh.f32 %v1201_v44  ;;  %v1202_v55 = vadd.f32 %v4232_v57, %v1149_v24 }
 0x559   :  { %v3766_v61 = vpop.eup %3765  ;;  %3777 = vtanh.f32 %v1204_v50 }
 0x55a   :  { %v3768_v63 = vpop.eup %3767  ;;  %3779 = vtanh.f32 %v1202_v55 }
 0x55b   :  { %v3770_v6 = vpop.eup %3769 }
 0x55c   :  { %v3772_v4 = vpop.eup %3771  ;;  %v3351_v12 = vpop.f32.mrb[40].mxu0  ;;  %v1230_v43 = vpack.c.bf16 %v3770_v6, %v3766_v61 }
 0x55d   :  { %v1207_v10 = vadd.f32 %v3351_v12, %v4232_v57  ;;  %v1162_v45 = vpop.f32.mrb[41].mxu0  ;;  %v1229_v36 = vpack.c.bf16 %v3772_v4, %v3768_v63 }
 0x55e   :  { %v1205_v59 = vadd.f32 %v4232_v57, %v1162_v45  ;;  %v3352_v46 = vpop.f32.mrb[42].mxu0 }
 0x55f   :  { %3781 = vtanh.f32 %v1207_v10  ;;  %v1208_v44 = vadd.f32 %v3352_v46, %v4232_v57  ;;  %v1165_v21 = vpop.f32.mrb[43].mxu0  ;;  %3389 = vmatprep.subr.bf16.mxu1 %v1229_v36  ;;  %3421 = vmatprep.subr.bf16.mxu0 %v1229_v36 }
 0x560   :  { %3783 = vtanh.f32 %v1205_v59  ;;  %v1206_v50 = vadd.f32 %v4232_v57, %v1165_v21  ;;  %3390 = vmatpush3.bf16.xpose.msra.mxu1 %v1229_v36  ;;  %3422 = vmatpush3.bf16.msra.mxu0 %v1229_v36 }
 0x561   :  { %v3774_v24 = vpop.eup %3773  ;;  %3785 = vtanh.f32 %v1208_v44  ;;  %3391 = vmatprep.subr.bf16.mxu1 %v1230_v43  ;;  %3423 = vmatprep.subr.bf16.mxu0 %v1230_v43 }
 0x562   :  { %v3776_v55 = vpop.eup %3775  ;;  %3787 = vtanh.f32 %v1206_v50 }
 0x563   :  { %v3778_v61 = vpop.eup %3777 }
 0x564   :  { %v3780_v45 = vpop.eup %3779  ;;  %v3355_v63 = vpop.f32.mrb[44].mxu0  ;;  %3424 = vmatpush3.bf16.msra.mxu0 %v1230_v43  ;;  %v1232_v6 = vpack.c.bf16 %v3778_v61, %v3774_v24 }
 0x565   :  { %v1211_v46 = vadd.f32 %v3355_v63, %v4232_v57  ;;  %v1178_v4 = vpop.f32.mrb[45].mxu0  ;;  %v1231_v12 = vpack.c.bf16 %v3780_v45, %v3776_v55 }
 0x566   :  { %v1209_v10 = vadd.f32 %v4232_v57, %v1178_v4  ;;  %v3356_v59 = vpop.f32.mrb[46].mxu0 }
 0x567   :  { %3789 = vtanh.f32 %v1211_v46  ;;  %v1212_v36 = vadd.f32 %v3356_v59, %v4232_v57  ;;  %v1181_v44 = vpop.f32.mrb[47].mxu0  ;;  %3425 = vmatprep.subr.bf16.mxu0 %v1231_v12 }
 0x568   :  { %3791 = vtanh.f32 %v1209_v10  ;;  %v1210_v21 = vadd.f32 %v4232_v57, %v1181_v44  ;;  %3392 = vmatpush3.bf16.xpose.msra.mxu1 %v1230_v43  ;;  %3426 = vmatpush3.bf16.msra.mxu0 %v1231_v12 }
 0x569   :  { %v3782_v50 = vpop.eup %3781  ;;  %3793 = vtanh.f32 %v1212_v36  ;;  %3393 = vmatprep.subr.bf16.mxu1 %v1231_v12  ;;  %3427 = vmatprep.subr.bf16.mxu0 %v1232_v6 }
 0x56a   :  { %v3784_v24 = vpop.eup %3783  ;;  %3795 = vtanh.f32 %v1210_v21  ;;  %v1543_v21 = vsel %vm1527_vm15, 65537, %v3926_v0 }
 0x56b   :  { %v3786_v55 = vpop.eup %3785 }
 0x56c   :  { %v3788_v61 = vpop.eup %3787  ;;  %3428 = vmatpush3.bf16.msra.mxu0 %v1232_v6  ;;  %v1234_v45 = vpack.c.bf16 %v3786_v55, %v3782_v50 }
 0x56d   :  { %v1233_v63 = vpack.c.bf16 %v3788_v61, %v3784_v24  ;;  %v1515_v24 = vld [vmem:[#allocation4 + $0xa8] sm:$0xf]  ;;  %v1514_v61 = vld [vmem:[#allocation4 + $0xa4] sm:$0xf] }
 0x56e   :  { %vm1531_vm6 = vcmp.gt.bf16.partialorder %v1515_v24, 0  ;;  %vm1530_vm7 = vcmp.gt.bf16.partialorder %v1514_v61, 0 }
 0x56f   :  { %3429 = vmatprep.subr.bf16.mxu0 %v1233_v63  ;;  %v1546_v28 = vsel %vm1530_vm7, 65537, %v3926_v0 }
 0x570   :  { %3394 = vmatpush3.bf16.xpose.msra.mxu1 %v1231_v12  ;;  %3430 = vmatpush3.bf16.msra.mxu0 %v1233_v63  ;;  %v1556_v12 = vunpack.c.l.b16 %v1540_v49 }
 0x571   :  { %v3790_v46 = vpop.eup %3789  ;;  %3395 = vmatprep.subr.bf16.mxu1 %v1232_v6  ;;  %3431 = vmatprep.subr.bf16.mxu0 %v1234_v45 }
 0x572   :  { %v3792_v57 = vpop.eup %3791  ;;  %vm1572_vm4 = vcmp.ne.s32.totalorder %v1556_v12, 0 }
 0x573   :  { %v3794_v43 = vpop.eup %3793 }
 0x574   :  { %v3796_v4 = vpop.eup %3795  ;;  %3432 = vmatpush3.bf16.msra.mxu0 %v1234_v45  ;;  %v1236_v10 = vpack.c.bf16 %v3794_v43, %v3790_v46 }
 0x575   :  { %v1235_v59 = vpack.c.bf16 %v3796_v4, %v3792_v57  ;;  %v1544_v57 = vsel %vm1528_vm2, 65537, %v3926_v0 }
 0x576   :  { %v1560_v1 = vunpack.c.l.b16 %v1544_v57 }
 0x577   :  { %3433 = vmatprep.subr.bf16.mxu0 %v1235_v59 }
 0x578   :  { %3396 = vmatpush3.bf16.xpose.msra.mxu1 %v1232_v6  ;;  %3434 = vmatpush3.bf16.msra.mxu0 %v1235_v59 }
 0x579   :  { %3397 = vmatprep.subr.bf16.mxu1 %v1233_v63  ;;  %3435 = vmatprep.subr.bf16.mxu0 %v1236_v10 }
 0x57c   :  { %3436 = vmatpush3.bf16.msra.mxu0 %v1236_v10 }
 0x580   :  { %3398 = vmatpush3.bf16.xpose.msra.mxu1 %v1233_v63 }
 0x581   :  { %3399 = vmatprep.subr.bf16.mxu1 %v1234_v45 }
 0x588   :  { %3400 = vmatpush3.bf16.xpose.msra.mxu1 %v1234_v45  ;;  %v1559_v45 = vunpack.c.l.b16 %v1543_v21 }
 0x589   :  { %3401 = vmatprep.subr.bf16.mxu1 %v1235_v59 }
 0x58a   :  { %vm1575_vm8 = vcmp.ne.s32.totalorder %v1559_v45, 0 }
 0x590   :  { %3402 = vmatpush3.bf16.xpose.msra.mxu1 %v1235_v59  ;;  %v1517_v59 = vld [vmem:[#allocation4 + $0xb0] sm:$0xf] }
 0x591   :  { %3403 = vmatprep.subr.bf16.mxu1 %v1236_v10  ;;  %vm1533_vm11 = vcmp.gt.bf16.partialorder %v1517_v59, 0 }
 0x598   :  { %3404 = vmatpush3.bf16.xpose.msra.mxu1 %v1236_v10  ;;  %v1516_v10 = vld [vmem:[#allocation4 + $0xac] sm:$0xf] }
 0x59f   :  { %3406 = vmatmul.mubr.bf16.vlgmr.msra.gmra.mrb[48].mxu1 %v1400_v17  ;;  %v1507_v17 = vld [vmem:[#allocation4 + $0x88] sm:$0xf] }
 0x5a0   :  { %3409 = vmatprep.mubr.bf16.mxu1 %v1401_v35  ;;  %vm1523_vm10 = vcmp.gt.bf16.partialorder %v1507_v17, 0 }
 0x5a1   :  { %v1539_v47 = vsel %vm1523_vm10, 65537, %v3926_v0  ;;  %vm1532_vm10 = vcmp.gt.bf16.partialorder %v1516_v10, 0 }
 0x5a2   :  { %v1555_v35 = vunpack.c.l.b16 %v1539_v47  ;;  %v1519_v47 = vld [vmem:[#allocation4 + $0xb8] sm:$0xf] }
 0x5a4   :  { %vm1571_vm1 = vcmp.ne.s32.totalorder %v1555_v35, 0 }
 0x5a7   :  { %3410 = vmatmul.mubr.bf16.gmra.mrb[52].mxu1 %v1402_v60  ;;  %v1509_v60 = vld [vmem:[#allocation4 + $0x90] sm:$0xf] }
 0x5a8   :  { %3413 = vmatprep.mubr.bf16.mxu1 %v1403_v54  ;;  %vm1525_vm12 = vcmp.gt.bf16.partialorder %v1509_v60, 0  ;;  %v1547_v60 = vsel %vm1531_vm6, 65537, %v3926_v0 }
 0x5a9   :  { %v1541_v51 = vsel %vm1525_vm12, 65537, %v3926_v0  ;;  %vm1576_vm12 = vcmp.ne.s32.totalorder %v1560_v1, 0  ;;  %v1563_v35 = vunpack.c.l.b16 %v1547_v60 }
 0x5aa   :  { %v1557_v36 = vunpack.c.l.b16 %v1541_v51  ;;  %v1548_v51 = vsel %vm1532_vm10, 65537, %v3926_v0 }
 0x5ab   :  { %v1564_v21 = vunpack.c.l.b16 %v1548_v51 }
 0x5ac   :  { %vm1573_vm5 = vcmp.ne.s32.totalorder %v1557_v36, 0 }
 0x5af   :  { %3414 = vmatmul.mubr.bf16.gmra.mrb[56].mxu1 %v1404_v34 }
 0x5b0   :  { %3417 = vmatprep.mubr.bf16.mxu1 %v1405_v32  ;;  %v1513_v32 = vld [vmem:[#allocation4 + $0xa0] sm:$0xf] }
 0x5b1   :  { %vm1529_vm3 = vcmp.gt.bf16.partialorder %v1513_v32, 0 }
 0x5b2   :  { %v1545_v43 = vsel %vm1529_vm3, 65537, %v3926_v0  ;;  %vm1580_vm3 = vcmp.ne.s32.totalorder %v1564_v21, 0 }
 0x5b3   :  { %v1561_v16 = vunpack.c.l.b16 %v1545_v43 }
 0x5b7   :  { %3418 = vmatmul.mubr.bf16.gmra.mrb[60].mxu1 %v1406_v19  ;;  %v1510_v19 = vld [vmem:[#allocation4 + $0x94] sm:$0xf] }
 0x5b8   :  { %vm1526_vm0 = vcmp.gt.bf16.partialorder %v1510_v19, 0  ;;  %v1518_v19 = vld [vmem:[#allocation4 + $0xb4] sm:$0xf] }
 0x5b9   :  { %v1542_v50 = vsel %vm1526_vm0, 65537, %v3926_v0  ;;  %vm1534_vm15 = vcmp.gt.bf16.partialorder %v1518_v19, 0  ;;  %vm1579_vm0 = vcmp.ne.s32.totalorder %v1563_v35, 0 }
 0x5ba   :  { %v1558_v63 = vunpack.c.l.b16 %v1542_v50  ;;  %v1550_v61 = vsel %vm1534_vm15, 65537, %v3926_v0 }
 0x5bb   :  { %v1566_v57 = vunpack.c.l.b16 %v1550_v61 }
 0x5bc   :  { %vm1574_vm9 = vcmp.ne.s32.totalorder %v1558_v63, 0 }
 0x5bd   :  { %vm1582_vm6 = vcmp.ne.s32.totalorder %v1566_v57, 0 }
 0x672   :  { %v3407_v38 = vpop.f32.mrb[48].mxu1 }
 0x673   :  { %v1441_v34 = vpop.f32.mrb[49].mxu1  ;;  %v4284_v55 = vsel %vm1571_vm1, %v3407_v38, -1e+30  ;;  %v1562_v38 = vunpack.c.l.b16 %v1546_v28 }
 0x674   :  { %v3408_v54 = vpop.f32.mrb[50].mxu1  ;;  %v4276_v33 = vsel %vm1569_vm13, %v1441_v34, -1e+30  ;;  %vm1577_vm13 = vcmp.ne.s32.totalorder %v1561_v16, 0  ;;  %v1549_v34 = vsel %vm1533_vm11, 65537, %v3926_v0 }
 0x675   :  { %1601 = vmax.xlane.f32.xlu0 %v4276_v33  ;;  %v1444_v6 = vpop.f32.mrb[51].mxu1  ;;  %v4289_v15 = vsel %vm1572_vm4, %v3408_v54, -1e+30  ;;  %v1520_v54 = vld [vmem:[#allocation4 + $0xbc] sm:$0xf]  ;;  %vm1578_vm1 = vcmp.ne.s32.totalorder %v1562_v38, 0  ;;  %v1565_v50 = vunpack.c.l.b16 %v1549_v34 }
 0x676   :  { %v4279_v44 = vsel %vm1570_vm14, %v1444_v6, -1e+30  ;;  %vm1535_vm14 = vcmp.gt.bf16.partialorder %v1519_v47, 0  ;;  %vm1536_vm2 = vcmp.gt.bf16.partialorder %v1520_v54, 0 }
 0x677   :  { %1603 = vmax.xlane.f32.xlu1 %v4279_v44  ;;  %v1551_v24 = vsel %vm1535_vm14, 65537, %v3926_v0  ;;  %vm1581_vm4 = vcmp.ne.s32.totalorder %v1565_v50, 0 }
 0x679   :  { %1605 = vmax.xlane.f32.xlu0 %v4284_v55 }
 0x67a   :  { %v3411_v46 = vpop.f32.mrb[52].mxu1 }
 0x67b   :  { %v1457_v4 = vpop.f32.mrb[53].mxu1  ;;  %v4297_v7 = vsel %vm1575_vm8, %v3411_v46, -1e+30  ;;  %v1567_v46 = vunpack.c.l.b16 %v1551_v24 }
 0x67c   :  { %v3412_v41 = vpop.f32.mrb[54].mxu1  ;;  %v4291_v17 = vsel %vm1573_vm5, %v1457_v4, -1e+30  ;;  %v1552_v4 = vsel %vm1536_vm2, 65537, %v3926_v0 }
 0x67d   :  { %1607 = vmax.xlane.f32.xlu0 %v4289_v15  ;;  %1609 = vmax.xlane.f32.xlu1 %v4291_v17  ;;  %v1460_v52 = vpop.f32.mrb[55].mxu1  ;;  %v4305_v6 = vsel %vm1576_vm12, %v3412_v41, -1e+30  ;;  %vm1583_vm5 = vcmp.ne.s32.totalorder %v1567_v46, 0  ;;  %v1568_v16 = vunpack.c.l.b16 %v1552_v4 }
 0x67e   :  { %v4299_v18 = vsel %vm1574_vm9, %v1460_v52, -1e+30 }
 0x67f   :  { %vm1584_vm7 = vcmp.ne.s32.totalorder %v1568_v16, 0 }
 0x681   :  { %1613 = vmax.xlane.f32.xlu1 %v4297_v7  ;;  %1611 = vmax.xlane.f32.xlu0 %v4299_v18 }
 0x682   :  { %v3415_v49 = vpop.f32.mrb[56].mxu1 }
 0x683   :  { %v1473_v48 = vpop.f32.mrb[57].mxu1  ;;  %v4313_v45 = vsel %vm1579_vm0, %v3415_v49, -1e+30 }
 0x684   :  { %v3416_v32 = vpop.f32.mrb[58].mxu1  ;;  %v4307_v12 = vsel %vm1577_vm13, %v1473_v48, -1e+30 }
 0x685   :  { %1615 = vmax.xlane.f32.xlu0 %v4305_v6  ;;  %1617 = vmax.xlane.f32.xlu1 %v4307_v12  ;;  %v1476_v36 = vpop.f32.mrb[59].mxu1  ;;  %v4320_v41 = vsel %vm1580_vm3, %v3416_v32, -1e+30 }
 0x686   :  { %v4315_v63 = vsel %vm1578_vm1, %v1476_v36, -1e+30 }
 0x689   :  { %1621 = vmax.xlane.f32.xlu1 %v4313_v45  ;;  %1619 = vmax.xlane.f32.xlu0 %v4315_v63 }
 0x68a   :  { %v3419_v43 = vpop.f32.mrb[60].mxu1 }
 0x68b   :  { %v1489_v10 = vpop.f32.mrb[61].mxu1  ;;  %v4326_v60 = vsel %vm1583_vm5, %v3419_v43, -1e+30 }
 0x68c   :  { %v3420_v59 = vpop.f32.mrb[62].mxu1  ;;  %v4322_v52 = vsel %vm1581_vm4, %v1489_v10, -1e+30 }
 0x68d   :  { %1623 = vmax.xlane.f32.xlu0 %v4320_v41  ;;  %1625 = vmax.xlane.f32.xlu1 %v4322_v52  ;;  %v1492_v1 = vpop.f32.mrb[63].mxu1  ;;  %v4332_v0 = vsel %vm1584_vm7, %v3420_v59, -1e+30 }
 0x68e   :  { %v4328_v28 = vsel %vm1582_vm6, %v1492_v1, -1e+30 }
 0x691   :  { %1629 = vmax.xlane.f32.xlu1 %v4326_v60  ;;  %1627 = vmax.xlane.f32.xlu0 %v4328_v28 }
 0x695   :  { %1631 = vmax.xlane.f32.xlu0 %v4332_v0 }
 0x702   :  { %v1602_v47 = vpop.xlane.xlu0 %1601 }
 0x703   :  { %v1633_v19 = vsub.f32 %v4276_v33, %v1602_v47 }
 0x704   :  { %v1604_v35 = vpop.xlane.xlu1 %1603 }
 0x705   :  { %v1649_v38 = vmul.f32 1.442695, %v1633_v19  ;;  %v1634_v49 = vsub.f32 %v4279_v44, %v1604_v35 }
 0x706   :  { %v1606_v51 = vpop.xlane.xlu0 %1605 }
 0x707   :  { %3797 = vpow2.f32 %v1649_v38  ;;  %v1651_v34 = vmul.f32 1.442695, %v1634_v49  ;;  %v1635_v48 = vsub.f32 %v4284_v55, %v1606_v51 }
 0x709   :  { %3799 = vpow2.f32 %v1651_v34  ;;  %v1653_v54 = vmul.f32 1.442695, %v1635_v48 }
 0x70a   :  { %v1608_v32 = vpop.xlane.xlu0 %1607  ;;  %v1610_v36 = vpop.xlane.xlu1 %1609 }
 0x70b   :  { %3801 = vpow2.f32 %v1653_v54  ;;  %v1636_v21 = vsub.f32 %v4289_v15, %v1608_v32  ;;  %v1637_v50 = vsub.f32 %v4291_v17, %v1610_v36 }
 0x70d   :  { %v1655_v24 = vmul.f32 1.442695, %v1636_v21  ;;  %v1657_v33 = vmul.f32 1.442695, %v1637_v50 }
 0x70e   :  { %v1614_v61 = vpop.xlane.xlu1 %1613  ;;  %v1612_v46 = vpop.xlane.xlu0 %1611 }
 0x70f   :  { %3803 = vpow2.f32 %v1655_v24  ;;  %v1639_v44 = vsub.f32 %v4297_v7, %v1614_v61  ;;  %v1638_v57 = vsub.f32 %v4299_v18, %v1612_v46 }
 0x710   :  { %3805 = vpow2.f32 %v1657_v33 }
 0x711   :  { %v4342_v55 = vpop.eup %3797  ;;  %v1661_v43 = vmul.f32 1.442695, %v1639_v44  ;;  %v1659_v4 = vmul.f32 1.442695, %v1638_v57 }
 0x712   :  { %v1616_v10 = vpop.xlane.xlu0 %1615  ;;  %v1618_v59 = vpop.xlane.xlu1 %1617  ;;  %1681 = vadd.xlane.f32.xlu1 %v4342_v55 }
 0x713   :  { %v4345_v15 = vpop.eup %3799  ;;  %3807 = vpow2.f32 %v1661_v43  ;;  %v1640_v17 = vsub.f32 %v4305_v6, %v1616_v10  ;;  %v1641_v1 = vsub.f32 %v4307_v12, %v1618_v59 }
 0x714   :  { %3809 = vpow2.f32 %v1659_v4  ;;  %1683 = vadd.xlane.f32.xlu0 %v4345_v15 }
 0x715   :  { %v4350_v7 = vpop.eup %3801  ;;  %v1663_v18 = vmul.f32 1.442695, %v1640_v17  ;;  %v1665_v16 = vmul.f32 1.442695, %v1641_v1 }
 0x716   :  { %v1622_v47 = vpop.xlane.xlu1 %1621  ;;  %v1620_v19 = vpop.xlane.xlu0 %1619  ;;  %1685 = vadd.xlane.f32.xlu1 %v4350_v7 }
 0x717   :  { %3811 = vpow2.f32 %v1663_v18  ;;  %v1643_v35 = vsub.f32 %v4313_v45, %v1622_v47  ;;  %v1642_v38 = vsub.f32 %v4315_v63, %v1620_v19 }
 0x718   :  { %3813 = vpow2.f32 %v1665_v16 }
 0x719   :  { %v4355_v6 = vpop.eup %3803  ;;  %v1669_v12 = vmul.f32 1.442695, %v1643_v35  ;;  %v1667_v49 = vmul.f32 1.442695, %v1642_v38 }
 0x71a   :  { %v4357_v51 = vpop.eup %3805  ;;  %v1624_v34 = vpop.xlane.xlu0 %1623  ;;  %1687 = vadd.xlane.f32.xlu0 %v4355_v6 }
 0x71b   :  { %v1626_v48 = vpop.xlane.xlu1 %1625  ;;  %3815 = vpow2.f32 %v1669_v12  ;;  %v1644_v54 = vsub.f32 %v4320_v41, %v1624_v34  ;;  %1689 = vadd.xlane.f32.xlu1 %v4357_v51 }
 0x71c   :  { %v1645_v45 = vsub.f32 %v4322_v52, %v1626_v48  ;;  %3817 = vpow2.f32 %v1667_v49 }
 0x71d   :  { %v4363_v63 = vpop.eup %3807  ;;  %v1671_v32 = vmul.f32 1.442695, %v1644_v54 }
 0x71e   :  { %v1673_v36 = vmul.f32 1.442695, %v1645_v45  ;;  %v4365_v21 = vpop.eup %3809  ;;  %v1628_v24 = vpop.xlane.xlu0 %1627 }
 0x71f   :  { %v1630_v50 = vpop.xlane.xlu1 %1629  ;;  %3819 = vpow2.f32 %v1671_v32  ;;  %1693 = vadd.xlane.f32.xlu1 %v4363_v63  ;;  %1691 = vadd.xlane.f32.xlu0 %v4365_v21  ;;  %v1646_v41 = vsub.f32 %v4328_v28, %v1628_v24 }
 0x720   :  { %v1647_v33 = vsub.f32 %v4326_v60, %v1630_v50  ;;  %3821 = vpow2.f32 %v1673_v36 }
 0x721   :  { %v4371_v52 = vpop.eup %3811  ;;  %v1675_v46 = vmul.f32 1.442695, %v1646_v41  ;;  %v3728_v41 = vld [vmem:[#allocation2 + $0x158] sm:$0xff]  }
 0x722   :  { %v1677_v61 = vmul.f32 1.442695, %v1647_v33  ;;  %v4373_v44 = vpop.eup %3813  ;;  %v1632_v57 = vpop.xlane.xlu0 %1631 }
 0x723   :  { %1697 = vadd.xlane.f32.xlu1 %v4373_v44  ;;  %1695 = vadd.xlane.f32.xlu0 %v4371_v52  ;;  %v1648_v43 = vsub.f32 %v4332_v0, %v1632_v57 }
 0x724   :  { %3823 = vpow2.f32 %v1677_v61 }
 0x725   :  { %3825 = vpow2.f32 %v1675_v46  ;;  %v4378_v60 = vpop.eup %3815  ;;  %v1679_v4 = vmul.f32 1.442695, %v1648_v43 }
 0x726   :  { %v4380_v28 = vpop.eup %3817 }
 0x727   :  { %3827 = vpow2.f32 %v1679_v4  ;;  %1701 = vadd.xlane.f32.xlu1 %v4378_v60  ;;  %1699 = vadd.xlane.f32.xlu0 %v4380_v28  ;;  %v3729_v4 = vld [vmem:[#allocation2 + $0x160] sm:$0xff]  }
 0x729   :  { %v4384_v10 = vpop.eup %3819 }
 0x72a   :  { %v4386_v59 = vpop.eup %3821 }
 0x72b   :  { %1705 = vadd.xlane.f32.xlu1 %v4386_v59  ;;  %1703 = vadd.xlane.f32.xlu0 %v4384_v10 }
 0x72e   :  { %v4390_v0 = vpop.eup %3823 }
 0x72f   :  { %v4392_v17 = vpop.eup %3825  ;;  %1709 = vadd.xlane.f32.xlu1 %v4390_v0 }
 0x730   :  { %1707 = vadd.xlane.f32.xlu0 %v4392_v17 }
 0x731   :  { %v4396_v1 = vpop.eup %3827 }
 0x734   :  { %1711 = vadd.xlane.f32.xlu0 %v4396_v1 }
 0x740   :  { %1753 = vrot.lane.b32.xlu1 %v675_v11, %s3923_s25  ;;  %v4686_v11 = vmax.f32 %v4155_v53, 0.0 }
 0x744   :  { %1757 = vrot.lane.b32.xlu1 %v677_v14, %s3923_s25  ;;  %v3725_v14 = vld [vmem:[#allocation2 + $0x140] sm:$0xff]  }
 0x745   :  { %3453 = vmatprep.subr.bf16.mxu0 %v3725_v14 }
 0x748   :  { %1759 = vrot.lane.b32.xlu1 %v678_v9, %s3923_s25  ;;  %v4685_v9 = vmax.f32 %v4164_v3, 0.0 }
 0x74a   :  { %1755 = vrot.lane.b32.xlu0 %v676_v13, %s3923_s25  ;;  %v4687_v13 = vmax.f32 %v4161_v62, 0.0 }
 0x74c   :  { %1763 = vrot.lane.b32.xlu1 %v680_v30, %s3923_s25 }
 0x74e   :  { %1761 = vrot.lane.b32.xlu0 %v679_v29, %s3923_s25 }
 0x750   :  { %1767 = vrot.lane.b32.xlu1 %v682_v27, %s3923_s25 }
 0x752   :  { %1765 = vrot.lane.b32.xlu0 %v681_v31, %s3923_s25 }
 0x754   :  { %1771 = vrot.lane.b32.xlu1 %v4681_v2, %s3923_s25 }
 0x756   :  { %1769 = vrot.lane.b32.xlu0 %v4682_v5, %s3923_s25 }
 0x758   :  { %1775 = vrot.lane.b32.xlu1 %v4683_v25, %s3923_s25 }
 0x75a   :  { %1773 = vrot.lane.b32.xlu0 %v4684_v8, %s3923_s25  ;;  %v3730_v8 = vld [vmem:[#allocation2 + $0x168] sm:$0xff]  }
 0x75c   :  { %1779 = vrot.lane.b32.xlu1 %v4685_v9, %s3923_s25 }
 0x75e   :  { %1777 = vrot.lane.b32.xlu0 %v4686_v11, %s3923_s25 }
 0x760   :  { %1783 = vrot.lane.b32.xlu1 %v4687_v13, %s3923_s25 }
 0x762   :  { %1781 = vrot.lane.b32.xlu0 %v4688_v20, %s3923_s25 }
 0x79f   :  { %v1682_v22 = vpop.xlane.xlu1 %1681 }
 0x7a0   :  { %3829 = vrcp.f32 %v1682_v22 }
 0x7a1   :  { %v1684_v23 = vpop.xlane.xlu0 %1683 }
 0x7a2   :  { %3831 = vrcp.f32 %v1684_v23 }
 0x7a3   :  { %v1686_v26 = vpop.xlane.xlu1 %1685 }
 0x7a4   :  { %3833 = vrcp.f32 %v1686_v26  ;;  %v3731_v26 = vld [vmem:[#allocation2 + $0x170] sm:$0xff]  }
 0x7a7   :  { %v1688_v27 = vpop.xlane.xlu0 %1687 }
 0x7a8   :  { %v1690_v29 = vpop.xlane.xlu1 %1689  ;;  %3835 = vrcp.f32 %v1688_v27  ;;  %v3732_v27 = vld [vmem:[#allocation2 + $0x178] sm:$0xff]  }
 0x7a9   :  { %3837 = vrcp.f32 %v1690_v29  ;;  %v3734_v29 = vld [vmem:[#allocation2 + $0x1c8] sm:$0xff]  }
 0x7aa   :  { %v3830_v30 = vpop.eup %3829 }
 0x7ab   :  { %v1729_v40 = vmul.f32 %v3830_v30, %v4342_v55  ;;  %v3726_v55 = vld [vmem:[#allocation2 + $0x148] sm:$0xff]  }
 0x7ac   :  { %v3832_v31 = vpop.eup %3831  ;;  %v1694_v37 = vpop.xlane.xlu1 %1693  ;;  %v3738_v30 = vld [vmem:[#allocation2 + $0x1e8] sm:$0xff]  }
 0x7ad   :  { %v1692_v39 = vpop.xlane.xlu0 %1691  ;;  %v1730_v42 = vmul.f32 %v3832_v31, %v4345_v15 }
 0x7ae   :  { %3839 = vrcp.f32 %v1692_v39  ;;  %v3834_v58 = vpop.eup %3833 }
 0x7af   :  { %v1745_v53 = vpack.c.bf16 %v1730_v42, %v1729_v40  ;;  %3841 = vrcp.f32 %v1694_v37  ;;  %v1731_v16 = vmul.f32 %v3834_v58, %v4350_v7  ;;  %v3727_v7 = vld [vmem:[#allocation2 + $0x150] sm:$0xff]  }
 0x7b0   :  { %v1698_v62 = vpop.xlane.xlu1 %1697 }
 0x7b1   :  { %v1696_v3 = vpop.xlane.xlu0 %1695  ;;  %3437 = vmatprep.mubr.bf16.mxu0 %v1745_v53 }
 0x7b2   :  { %v3836_v18 = vpop.eup %3835  ;;  %3843 = vrcp.f32 %v1696_v3 }
 0x7b3   :  { %v1732_v47 = vmul.f32 %v3836_v18, %v4355_v6  ;;  %3845 = vrcp.f32 %v1698_v62  ;;  %v3838_v12 = vpop.eup %3837 }
 0x7b4   :  { %v1702_v19 = vpop.xlane.xlu1 %1701  ;;  %v1733_v48 = vmul.f32 %v3838_v12, %v4357_v51 }
 0x7b5   :  { %v1700_v35 = vpop.xlane.xlu0 %1699  ;;  %v1746_v38 = vpack.c.bf16 %v1732_v47, %v1731_v16 }
 0x7b6   :  { %3847 = vrcp.f32 %v1700_v35 }
 0x7b7   :  { %3438 = vmatmul.mubr.bf16.vlgmr.msra.gmra.mrb[48].mxu0 %v1746_v38  ;;  %3849 = vrcp.f32 %v1702_v19 }
 0x7b8   :  { %v3840_v15 = vpop.eup %3839  ;;  %v1706_v49 = vpop.xlane.xlu1 %1705  ;;  %3454 = vmatpush3.bf16.msra.mxu0 %v3725_v14 }
 0x7b9   :  { %v1704_v34 = vpop.xlane.xlu0 %1703  ;;  %v1734_v54 = vmul.f32 %v3840_v15, %v4365_v21  ;;  %3455 = vmatprep.subr.bf16.mxu0 %v3726_v55  ;;  %v3842_v6 = vpop.eup %3841 }
 0x7ba   :  { %3851 = vrcp.f32 %v1704_v34  ;;  %v1735_v24 = vmul.f32 %v3842_v6, %v4363_v63 }
 0x7bb   :  { %v1747_v45 = vpack.c.bf16 %v1734_v54, %v1733_v48  ;;  %3853 = vrcp.f32 %v1706_v49 }
 0x7bc   :  { %v3844_v32 = vpop.eup %3843  ;;  %v1710_v36 = vpop.xlane.xlu1 %1709  ;;  %3456 = vmatpush3.bf16.msra.mxu0 %v3726_v55 }
 0x7bd   :  { %v1708_v50 = vpop.xlane.xlu0 %1707  ;;  %3441 = vmatprep.mubr.bf16.mxu0 %v1747_v45  ;;  %v1736_v33 = vmul.f32 %v3844_v32, %v4371_v52  ;;  %3457 = vmatprep.subr.bf16.mxu0 %v3727_v7  ;;  %v3846_v51 = vpop.eup %3845 }
 0x7be   :  { %3855 = vrcp.f32 %v1708_v50  ;;  %v1737_v57 = vmul.f32 %v3846_v51, %v4373_v44 }
 0x7bf   :  { %3857 = vrcp.f32 %v1710_v36  ;;  %v1748_v21 = vpack.c.bf16 %v1736_v33, %v1735_v24 }
 0x7c0   :  { %v3848_v61 = vpop.eup %3847  ;;  %3458 = vmatpush3.bf16.msra.mxu0 %v3727_v7  ;;  %v1754_v31 = vpop.permute.xlu1 %1753 }
 0x7c1   :  { %v1712_v46 = vpop.xlane.xlu0 %1711  ;;  %3442 = vmatmul.mubr.bf16.gmra.mrb[52].mxu0 %v1748_v21  ;;  %v1738_v43 = vmul.f32 %v3848_v61, %v4380_v28  ;;  %3459 = vmatprep.subr.bf16.mxu0 %v3728_v41  ;;  %v3850_v63 = vpop.eup %3849 }
 0x7c2   :  { %3859 = vrcp.f32 %v1712_v46  ;;  %v1739_v5 = vmul.f32 %v3850_v63, %v4378_v60 }
 0x7c3   :  { %v1749_v2 = vpack.c.bf16 %v1738_v43, %v1737_v57 }
 0x7c4   :  { %v3852_v52 = vpop.eup %3851  ;;  %3460 = vmatpush3.bf16.msra.mxu0 %v3728_v41  ;;  %v1758_v37 = vpop.permute.xlu1 %1757 }
 0x7c5   :  { %3445 = vmatprep.mubr.bf16.mxu0 %v1749_v2  ;;  %v1740_v25 = vmul.f32 %v3852_v52, %v4384_v10  ;;  %3461 = vmatprep.subr.bf16.mxu0 %v3729_v4  ;;  %v3854_v9 = vpop.eup %3853  ;;  %v1756_v39 = vpop.permute.xlu0 %1755 }
 0x7c6   :  { %v1741_v28 = vmul.f32 %v3854_v9, %v4386_v59  ;;  %v3733_v59 = vld [vmem:[#allocation2 + $0x1c0] sm:$0xff]  }
 0x7c7   :  { %v1750_v11 = vpack.c.bf16 %v1740_v25, %v1739_v5  ;;  %3485 = vmatprep.subr.bf16.mxu1 %v3733_v59 }
 0x7c8   :  { %v3856_v13 = vpop.eup %3855  ;;  %3462 = vmatpush3.bf16.msra.mxu0 %v3729_v4  ;;  %3486 = vmatpush3.bf16.msra.mxu1 %v3733_v59  ;;  %v1760_v40 = vpop.permute.xlu1 %1759  ;;  %v3740_v59 = vld [vmem:[#allocation2 + $0x1f8] sm:$0xff]  }
 0x7c9   :  { %v3858_v44 = vpop.eup %3857  ;;  %3446 = vmatmul.mubr.bf16.gmra.mrb[56].mxu0 %v1750_v11  ;;  %v1742_v14 = vmul.f32 %v3856_v13, %v4392_v17  ;;  %3463 = vmatprep.subr.bf16.mxu0 %v3730_v8  ;;  %v3735_v17 = vld [vmem:[#allocation2 + $0x1d0] sm:$0xff]   ;;  %v1762_v42 = vpop.permute.xlu0 %1761 }
 0x7ca   :  { %v1743_v23 = vmul.f32 %v3858_v44, %v4390_v0  ;;  %3487 = vmatprep.subr.bf16.mxu1 %v3734_v29  ;;  %v3736_v0 = vld [vmem:[#allocation2 + $0x1d8] sm:$0xff]  }
 0x7cb   :  { %v1751_v22 = vpack.c.bf16 %v1742_v14, %v1741_v28 }
 0x7cc   :  { %v3860_v20 = vpop.eup %3859  ;;  %3464 = vmatpush3.bf16.msra.mxu0 %v3730_v8  ;;  %3488 = vmatpush3.bf16.msra.mxu1 %v3734_v29  ;;  %v1764_v53 = vpop.permute.xlu1 %1763  ;;  %v3741_v29 = vld [vmem:[#allocation2 + $0x180] sm:$0xff]  }
 0x7cd   :  { %v1744_v60 = vmul.f32 %v3860_v20, %v4396_v1  ;;  %3449 = vmatprep.mubr.bf16.mxu0 %v1751_v22  ;;  %3465 = vmatprep.subr.bf16.mxu0 %v3731_v26  ;;  %v3737_v1 = vld [vmem:[#allocation2 + $0x1e0] sm:$0xff]   ;;  %v1766_v18 = vpop.permute.xlu0 %1765 }
 0x7ce   :  { %3489 = vmatprep.subr.bf16.mxu1 %v3735_v17 }
 0x7cf   :  { %v1752_v10 = vpack.c.bf16 %v1744_v60, %v1743_v23 }
 0x7d0   :  { %3466 = vmatpush3.bf16.msra.mxu0 %v3731_v26  ;;  %3490 = vmatpush3.bf16.msra.mxu1 %v3735_v17  ;;  %v1768_v35 = vpop.permute.xlu1 %1767  ;;  %v1909_v17 = vsub.s32 2, %v4065_v56 }
 0x7d1   :  { %3450 = vmatmul.mubr.bf16.gmra.mrb[60].mxu0 %v1752_v10  ;;  %3467 = vmatprep.subr.bf16.mxu0 %v3732_v27  ;;  %v1770_v49 = vpop.permute.xlu0 %1769 }
 0x7d2   :  { %3491 = vmatprep.subr.bf16.mxu1 %v3736_v0 }
 0x7d4   :  { %3468 = vmatpush3.bf16.msra.mxu0 %v3732_v27  ;;  %3492 = vmatpush3.bf16.msra.mxu1 %v3736_v0  ;;  %v1772_v34 = vpop.permute.xlu1 %1771  ;;  %v3739_v27 = vld [vmem:[#allocation2 + $0x1f0] sm:$0xff]   ;;  %v4491_v0 = vld [vmem:[%s4671_s3] sm:$0xff] }
 0x7d5   :  { %3493 = vmatprep.subr.bf16.mxu1 %v3737_v1  ;;  %v1774_v24 = vpop.permute.xlu0 %1773 }
 0x7d8   :  { %3494 = vmatpush3.bf16.msra.mxu1 %v3737_v1  ;;  %v1776_v41 = vpop.permute.xlu1 %1775  ;;  %v1910_v1 = vrot.slane %v4491_v0, %v1909_v17  ;;  %v4566_v17 = vld [vmem:[#allocation2 + $0x228] sm:$0xff]  }
 0x7d9   :  { %3495 = vmatprep.subr.bf16.mxu1 %v3738_v30  ;;  %v1778_v57 = vpop.permute.xlu0 %1777 }
 0x7dc   :  { %3496 = vmatpush3.bf16.msra.mxu1 %v3738_v30  ;;  %v1780_v2 = vpop.permute.xlu1 %1779 }
 0x7dd   :  { %v1782_v11 = vpop.permute.xlu0 %1781  ;;  %3497 = vmatprep.subr.bf16.mxu1 %v3739_v27 }
 0x7e0   :  { %v1784_v44 = vpop.permute.xlu1 %1783  ;;  %3498 = vmatpush3.bf16.msra.mxu1 %v3739_v27  ;;  %v4552_v27 = vld [vmem:[#allocation2 + $0x210] sm:$0xff]  }
 0x7e1   :  { %3499 = vmatprep.subr.bf16.mxu1 %v3740_v59 }
 0x7e4   :  { %3500 = vmatpush3.bf16.msra.mxu1 %v3740_v59  ;;  %v4556_v59 = vld [vmem:[#allocation2 + $0x218] sm:$0xff]  }
 0x7e5   :  { %3517 = vmatprep.subr.bf16.mxu1 %v3741_v29 }
 0x88a   :  { %v3439_v58 = vpop.f32.mrb[48].mxu0 }
 0x88b   :  { %v1819_v62 = vpop.f32.mrb[49].mxu0  ;;  %v1828_v16 = vadd.f32 %v3439_v58, %v1758_v37 }
 0x88c   :  { %v3440_v3 = vpop.f32.mrb[50].mxu0  ;;  %v1820_v38 = vadd.f32 %v1819_v62, %v1754_v31 }
 0x88d   :  { %v1831_v47 = vadd.f32 %v3440_v3, %v1760_v40  ;;  %v1822_v19 = vpop.f32.mrb[51].mxu0 }
 0x88e   :  { %v1823_v55 = vadd.f32 %v1822_v19, %v1756_v39  ;;  %v3743_v19 = vld [vmem:[#allocation2 + $0x190] sm:$0xff]  }
 0x88f   :  { %v4463_v12 = vpack.c.bf16 %v1831_v47, %v1828_v16 }
 0x890   :  { %v4465_v15 = vpack.c.bf16 %v1823_v55, %v1820_v38 }
 0x892   :  { %3469 = vmatprep.mubr.bf16.mxu0 %v4465_v15 }
 0x893   :  { %3470 = vmatmul.mubr.bf16.vlgmr.msra.gmra.mrb[64].mxu0 %v4463_v12 }
 0x894   :  { %v3443_v48 = vpop.f32.mrb[52].mxu0 }
 0x895   :  { %v1835_v54 = vpop.f32.mrb[53].mxu0  ;;  %v1844_v6 = vadd.f32 %v3443_v48, %v1766_v18  ;;  %v3742_v18 = vld [vmem:[#allocation2 + $0x188] sm:$0xff]  }
 0x896   :  { %v3444_v7 = vpop.f32.mrb[54].mxu0  ;;  %v1836_v36 = vadd.f32 %v1835_v54, %v1762_v42  ;;  %v3744_v54 = vld [vmem:[#allocation2 + $0x198] sm:$0xff]  }
 0x897   :  { %v1847_v45 = vadd.f32 %v3444_v7, %v1768_v35  ;;  %v1838_v32 = vpop.f32.mrb[55].mxu0 }
 0x898   :  { %v1839_v50 = vadd.f32 %v1838_v32, %v1764_v53 }
 0x899   :  { %v4469_v33 = vpack.c.bf16 %v1847_v45, %v1844_v6 }
 0x89a   :  { %v4471_v51 = vpack.c.bf16 %v1839_v50, %v1836_v36  ;;  %v3745_v36 = vld [vmem:[#allocation2 + $0x1a0] sm:$0xff]  }
 0x89c   :  { %v3447_v21 = vpop.f32.mrb[56].mxu0  ;;  %3473 = vmatprep.mubr.bf16.mxu0 %v4471_v51 }
 0x89d   :  { %v1851_v61 = vpop.f32.mrb[57].mxu0  ;;  %3474 = vmatmul.mubr.bf16.gmra.mrb[68].mxu0 %v4469_v33  ;;  %v1860_v43 = vadd.f32 %v3447_v21, %v1774_v24 }
 0x89e   :  { %v3448_v46 = vpop.f32.mrb[58].mxu0  ;;  %v1852_v52 = vadd.f32 %v1851_v61, %v1770_v49 }
 0x89f   :  { %v1863_v4 = vadd.f32 %v3448_v46, %v1776_v41  ;;  %v1854_v63 = vpop.f32.mrb[59].mxu0 }
 0x8a0   :  { %v1855_v5 = vadd.f32 %v1854_v63, %v1772_v34 }
 0x8a1   :  { %v4475_v25 = vpack.c.bf16 %v1863_v4, %v1860_v43 }
 0x8a2   :  { %v4477_v8 = vpack.c.bf16 %v1855_v5, %v1852_v52  ;;  %v3747_v52 = vld [vmem:[#allocation2 + $0x1b0] sm:$0xff]  }
 0x8a4   :  { %v3451_v9 = vpop.f32.mrb[60].mxu0  ;;  %3477 = vmatprep.mubr.bf16.mxu0 %v4477_v8 }
 0x8a5   :  { %v1867_v13 = vpop.f32.mrb[61].mxu0  ;;  %3478 = vmatmul.mubr.bf16.gmra.mrb[72].mxu0 %v4475_v25  ;;  %v1876_v14 = vadd.f32 %v3451_v9, %v1782_v11 }
 0x8a6   :  { %v3452_v28 = vpop.f32.mrb[62].mxu0  ;;  %v1868_v23 = vadd.f32 %v1867_v13, %v1778_v57  ;;  %v3746_v57 = vld [vmem:[#allocation2 + $0x1a8] sm:$0xff]  }
 0x8a7   :  { %v1879_v20 = vadd.f32 %v3452_v28, %v1784_v44  ;;  %v1870_v22 = vpop.f32.mrb[63].mxu0 }
 0x8a8   :  { %v1871_v60 = vadd.f32 %v1870_v22, %v1780_v2 }
 0x8a9   :  { %v4481_v10 = vpack.c.bf16 %v1879_v20, %v1876_v14  ;;  %v3748_v14 = vld [vmem:[#allocation2 + $0x1b8] sm:$0xff]  }
 0x8aa   :  { %v4483_v26 = vpack.c.bf16 %v1871_v60, %v1868_v23  ;;  %v4542_v23 = vld [vmem:[#allocation2 + $0x200] sm:$0xff]   ;;  %v4546_v60 = vld [vmem:[#allocation2 + $0x208] sm:$0xff]  }
 0x8ac   :  { %3481 = vmatprep.mubr.bf16.mxu0 %v4483_v26 }
 0x8ad   :  { %3482 = vmatmul.mubr.bf16.gmra.mrb[76].mxu0 %v4481_v10 }
 0x966   :  { %v3471_v30 = vpop.f32.mrb[64].mxu0 }
 0x967   :  { %v1993_v31 = vpop.f32.mrb[65].mxu0  ;;  %v4500_v58 = vadd.f32 %v3471_v30, %v1910_v1  ;;  %v4576_v30 = vld [vmem:[#allocation2 + $0x238] sm:$0xff]  }
 0x968   :  { %v3472_v37 = vpop.f32.mrb[66].mxu0  ;;  %v4496_v42 = vadd.f32 %v1993_v31, %v1910_v1  ;;  %v3757_v31 = vld [vmem:[#allocation2 + $0x240] sm:$0xff]  }
 0x969   :  { %v4494_v39 = vadd.f32 %v3472_v37, %v1910_v1  ;;  %v1996_v40 = vpop.f32.mrb[67].mxu0  ;;  %v3758_v37 = vld [vmem:[#allocation2 + $0x248] sm:$0xff]   ;;  %3549 = vmatprep.subr.bf16.mxu0 %v3757_v31 }
 0x96a   :  { %v4498_v53 = vadd.f32 %v1996_v40, %v1910_v1  ;;  %3550 = vmatpush3.bf16.msra.mxu0 %v3757_v31  ;;  %v3759_v40 = vld [vmem:[#allocation2 + $0x250] sm:$0xff]  }
 0x96b   :  { %v2074_v3 = vpack.c.bf16 %v4494_v39, %v4500_v58  ;;  %3551 = vmatprep.subr.bf16.mxu0 %v3758_v37 }
 0x96c   :  { %v2073_v62 = vpack.c.bf16 %v4498_v53, %v4496_v42 }
 0x96e   :  { %3501 = vmatprep.mubr.bf16.mxu1 %v2073_v62  ;;  %3552 = vmatpush3.bf16.msra.mxu0 %v3758_v37  ;;  %v3760_v62 = vld [vmem:[#allocation2 + $0x258] sm:$0xff]  }
 0x96f   :  { %3502 = vmatmul.mubr.bf16.vlgmr.msra.gmra.mrb[64].mxu1 %v2074_v3  ;;  %3553 = vmatprep.subr.bf16.mxu0 %v3759_v40  ;;  %v3762_v3 = vld [vmem:[#allocation2 + $0x268] sm:$0xff]  }
 0x970   :  { %v3475_v16 = vpop.f32.mrb[68].mxu0  ;;  %3518 = vmatpush3.bf16.msra.mxu1 %v3741_v29  ;;  %v4562_v29 = vld [vmem:[#allocation2 + $0x220] sm:$0xff]  }
 0x971   :  { %v2009_v47 = vpop.f32.mrb[69].mxu0  ;;  %3519 = vmatprep.subr.bf16.mxu1 %v3742_v18  ;;  %v4512_v48 = vadd.f32 %v3475_v16, %v1910_v1 }
 0x972   :  { %v3476_v35 = vpop.f32.mrb[70].mxu0  ;;  %v4508_v49 = vadd.f32 %v2009_v47, %v1910_v1  ;;  %3554 = vmatpush3.bf16.msra.mxu0 %v3759_v40 }
 0x973   :  { %v4506_v38 = vadd.f32 %v3476_v35, %v1910_v1  ;;  %v2012_v55 = vpop.f32.mrb[71].mxu0  ;;  %3555 = vmatprep.subr.bf16.mxu0 %v3760_v62 }
 0x974   :  { %v4510_v34 = vadd.f32 %v2012_v55, %v1910_v1  ;;  %3520 = vmatpush3.bf16.msra.mxu1 %v3742_v18 }
 0x975   :  { %3521 = vmatprep.subr.bf16.mxu1 %v3743_v19  ;;  %v2076_v6 = vpack.c.bf16 %v4506_v38, %v4512_v48 }
 0x976   :  { %v2075_v7 = vpack.c.bf16 %v4510_v34, %v4508_v49  ;;  %3556 = vmatpush3.bf16.msra.mxu0 %v3760_v62 }
 0x978   :  { %v3479_v45 = vpop.f32.mrb[72].mxu0  ;;  %3505 = vmatprep.mubr.bf16.mxu1 %v2075_v7  ;;  %3522 = vmatpush3.bf16.msra.mxu1 %v3743_v19 }
 0x979   :  { %v2025_v32 = vpop.f32.mrb[73].mxu0  ;;  %3506 = vmatmul.mubr.bf16.gmra.mrb[68].mxu1 %v2076_v6  ;;  %3523 = vmatprep.subr.bf16.mxu1 %v3744_v54  ;;  %v4524_v46 = vadd.f32 %v3479_v45, %v1910_v1 }
 0x97a   :  { %v3480_v50 = vpop.f32.mrb[74].mxu0  ;;  %v4520_v21 = vadd.f32 %v2025_v32, %v1910_v1 }
 0x97b   :  { %v4518_v24 = vadd.f32 %v3480_v50, %v1910_v1  ;;  %v2028_v41 = vpop.f32.mrb[75].mxu0 }
 0x97c   :  { %v4522_v61 = vadd.f32 %v2028_v41, %v1910_v1  ;;  %3524 = vmatpush3.bf16.msra.mxu1 %v3744_v54 }
 0x97d   :  { %3525 = vmatprep.subr.bf16.mxu1 %v3745_v36  ;;  %v2078_v4 = vpack.c.bf16 %v4518_v24, %v4524_v46 }
 0x97e   :  { %v2077_v43 = vpack.c.bf16 %v4522_v61, %v4520_v21 }
 0x980   :  { %v3483_v63 = vpop.f32.mrb[76].mxu0  ;;  %3509 = vmatprep.mubr.bf16.mxu1 %v2077_v43  ;;  %3526 = vmatpush3.bf16.msra.mxu1 %v3745_v36 }
 0x981   :  { %v2041_v2 = vpop.f32.mrb[77].mxu0  ;;  %3510 = vmatmul.mubr.bf16.gmra.mrb[72].mxu1 %v2078_v4  ;;  %3527 = vmatprep.subr.bf16.mxu1 %v3746_v57  ;;  %v4536_v28 = vadd.f32 %v3483_v63, %v1910_v1 }
 0x982   :  { %v3484_v5 = vpop.f32.mrb[78].mxu0  ;;  %v4532_v13 = vadd.f32 %v2041_v2, %v1910_v1 }
 0x983   :  { %v4530_v9 = vadd.f32 %v3484_v5, %v1910_v1  ;;  %v2044_v11 = vpop.f32.mrb[79].mxu0 }
 0x984   :  { %v4534_v44 = vadd.f32 %v2044_v11, %v1910_v1  ;;  %3528 = vmatpush3.bf16.msra.mxu1 %v3746_v57  ;;  %v4572_v1 = vld [vmem:[#allocation2 + $0x230] sm:$0xff]  }
 0x985   :  { %3529 = vmatprep.subr.bf16.mxu1 %v3747_v52  ;;  %v2080_v22 = vpack.c.bf16 %v4530_v9, %v4536_v28 }
 0x986   :  { %v2079_v20 = vpack.c.bf16 %v4534_v44, %v4532_v13 }
 0x988   :  { %3513 = vmatprep.mubr.bf16.mxu1 %v2079_v20  ;;  %3530 = vmatpush3.bf16.msra.mxu1 %v3747_v52 }
 0x989   :  { %3514 = vmatmul.mubr.bf16.gmra.mrb[76].mxu1 %v2080_v22  ;;  %3531 = vmatprep.subr.bf16.mxu1 %v3748_v14 }
 0x98a   :  { %3533 = vmatprep.mubr.bf16.mxu1 %v4465_v15 }
 0x98c   :  { %3532 = vmatpush3.bf16.msra.mxu1 %v3748_v14 }
 0x98d   :  { %3613 = vmatprep.subr.bf16.mxu1 %v4542_v23 }
 0x991   :  { %3534 = vmatmul.mubr.bf16.vlgmr.msra.gmra.mrb[64].mxu1 %v4463_v12 }
 0x992   :  { %3537 = vmatprep.mubr.bf16.mxu1 %v4471_v51  ;;  %3621 = vmatpush3.bf16.msra.mxu1 %v4542_v23 }
 0x993   :  { %3614 = vmatprep.subr.bf16.mxu1 %v4546_v60 }
 0x996   :  { %3622 = vmatpush3.bf16.msra.mxu1 %v4546_v60 }
 0x997   :  { %3615 = vmatprep.subr.bf16.mxu1 %v4552_v27 }
 0x999   :  { %3538 = vmatmul.mubr.bf16.gmra.mrb[68].mxu1 %v4469_v33 }
 0x99a   :  { %3541 = vmatprep.mubr.bf16.mxu1 %v4477_v8  ;;  %3623 = vmatpush3.bf16.msra.mxu1 %v4552_v27 }
 0x99b   :  { %3616 = vmatprep.subr.bf16.mxu1 %v4556_v59 }
 0x99e   :  { %3624 = vmatpush3.bf16.msra.mxu1 %v4556_v59 }
 0x99f   :  { %3617 = vmatprep.subr.bf16.mxu1 %v4562_v29 }
 0x9a1   :  { %3542 = vmatmul.mubr.bf16.gmra.mrb[72].mxu1 %v4475_v25 }
 0x9a2   :  { %3545 = vmatprep.mubr.bf16.mxu1 %v4483_v26  ;;  %3625 = vmatpush3.bf16.msra.mxu1 %v4562_v29 }
 0x9a3   :  { %3618 = vmatprep.subr.bf16.mxu1 %v4566_v17 }
 0x9a6   :  { %3626 = vmatpush3.bf16.msra.mxu1 %v4566_v17 }
 0x9a7   :  { %3619 = vmatprep.subr.bf16.mxu1 %v4572_v1 }
 0x9a9   :  { %3546 = vmatmul.mubr.bf16.gmra.mrb[76].mxu1 %v4481_v10 }
 0x9aa   :  { %3627 = vmatpush3.bf16.msra.mxu1 %v4572_v1  ;;  %3605 = vmatprep.mubr.bf16.mxu1 %v4477_v8  ;;  %v3761_v8 = vld [vmem:[#allocation2 + $0x260] sm:$0xff]  }
 0x9ab   :  { %3620 = vmatprep.subr.bf16.mxu1 %v4576_v30  ;;  %3557 = vmatprep.subr.bf16.mxu0 %v3761_v8 }
 0x9ac   :  { %3558 = vmatpush3.bf16.msra.mxu0 %v3761_v8 }
 0x9ad   :  { %3559 = vmatprep.subr.bf16.mxu0 %v3762_v3 }
 0x9ae   :  { %3628 = vmatpush3.bf16.msra.mxu1 %v4576_v30 }
 0x9b0   :  { %3560 = vmatpush3.bf16.msra.mxu0 %v3762_v3 }
 0x9b1   :  { %3606 = vmatmul.mubr.bf16.vlgmr.msra.gmra.mrb[80].mxu1 %v4475_v25  ;;  %v3763_v25 = vld [vmem:[#allocation2 + $0x270] sm:$0xff]  }
 0x9b2   :  { %3609 = vmatprep.mubr.bf16.mxu1 %v4483_v26  ;;  %3561 = vmatprep.subr.bf16.mxu0 %v3763_v25  ;;  %v3764_v26 = vld [vmem:[#allocation2 + $0x278] sm:$0xff]  }
 0x9b4   :  { %3562 = vmatpush3.bf16.msra.mxu0 %v3763_v25 }
 0x9b5   :  { %3563 = vmatprep.subr.bf16.mxu0 %v3764_v26 }
 0x9b8   :  { %3564 = vmatpush3.bf16.msra.mxu0 %v3764_v26 }
 0x9b9   :  { %3610 = vmatmul.mubr.bf16.gmra.mrb[84].mxu1 %v4481_v10  ;;  %v2390_v10 = vsub.s32 3, %v4065_v56  ;;  %3581 = vmatprep.subr.bf16.mxu0 %v4542_v23 }
 0x9bb   :  { %v2391_v18 = vrot.slane %v4491_v0, %v2390_v10 }
 0xa64   :  { %v3535_v16 = vpop.f32.mrb[64].mxu1 }
 0xa65   :  { %v2325_v47 = vpop.f32.mrb[65].mxu1  ;;  %v2394_v7 = vadd.f32 %v3535_v16, %v2391_v18 }
 0xa66   :  { %v2392_v19 = vadd.f32 %v2391_v18, %v2325_v47  ;;  %v3536_v35 = vpop.f32.mrb[66].mxu1 }
 0xa67   :  { %v2328_v55 = vpop.f32.mrb[67].mxu1  ;;  %v2395_v6 = vadd.f32 %v3536_v35, %v2391_v18 }
 0xa68   :  { %v2393_v54 = vadd.f32 %v2391_v18, %v2328_v55  ;;  %2408 = vrot.lane.b32.xlu0 %v2392_v19, %s3923_s25 }
 0xa6a   :  { %2410 = vrot.lane.b32.xlu1 %v2393_v54, %s3923_s25 }
 0xa6c   :  { %2412 = vrot.lane.b32.xlu0 %v2394_v7, %s3923_s25  ;;  %v3539_v45 = vpop.f32.mrb[68].mxu1 }
 0xa6d   :  { %v2341_v32 = vpop.f32.mrb[69].mxu1  ;;  %v2398_v43 = vadd.f32 %v3539_v45, %v2391_v18  ;;  %v2765_v45 = vsub.s32 5, %v4065_v56 }
 0xa6e   :  { %v2396_v36 = vadd.f32 %v2391_v18, %v2341_v32  ;;  %2414 = vrot.lane.b32.xlu1 %v2395_v6, %s3923_s25  ;;  %v3540_v50 = vpop.f32.mrb[70].mxu1 }
 0xa6f   :  { %v2344_v41 = vpop.f32.mrb[71].mxu1  ;;  %v2399_v4 = vadd.f32 %v3540_v50, %v2391_v18  ;;  %v2766_v32 = vrot.slane %v4491_v0, %v2765_v45 }
 0xa70   :  { %v2397_v57 = vadd.f32 %v2391_v18, %v2344_v41  ;;  %2416 = vrot.lane.b32.xlu0 %v2396_v36, %s3923_s25  ;;  %v2780_v36 = vsub.s32 6, %v4065_v56 }
 0xa72   :  { %2418 = vrot.lane.b32.xlu1 %v2397_v57, %s3923_s25  ;;  %v4613_v50 = vrot.slane %v4491_v0, %v2780_v36 }
 0xa74   :  { %2420 = vrot.lane.b32.xlu0 %v2398_v43, %s3923_s25  ;;  %v3543_v63 = vpop.f32.mrb[72].mxu1  ;;  %v4616_v41 = vadd.f32 %v4613_v50, %v2392_v19 }
 0xa75   :  { %v2357_v2 = vpop.f32.mrb[73].mxu1  ;;  %v2402_v20 = vadd.f32 %v3543_v63, %v2391_v18 }
 0xa76   :  { %v2400_v52 = vadd.f32 %v2391_v18, %v2357_v2  ;;  %2422 = vrot.lane.b32.xlu1 %v2399_v4, %s3923_s25  ;;  %v3544_v5 = vpop.f32.mrb[74].mxu1 }
 0xa77   :  { %v2360_v11 = vpop.f32.mrb[75].mxu1  ;;  %v2403_v22 = vadd.f32 %v3544_v5, %v2391_v18 }
 0xa78   :  { %v2401_v14 = vadd.f32 %v2391_v18, %v2360_v11  ;;  %2424 = vrot.lane.b32.xlu0 %v2400_v52, %s3923_s25 }
 0xa7a   :  { %2426 = vrot.lane.b32.xlu1 %v2401_v14, %s3923_s25 }
 0xa7c   :  { %2428 = vrot.lane.b32.xlu0 %v2402_v20, %s3923_s25  ;;  %v3547_v31 = vpop.f32.mrb[76].mxu1 }
 0xa7d   :  { %v2373_v37 = vpop.f32.mrb[77].mxu1  ;;  %v2406_v25 = vadd.f32 %v3547_v31, %v2391_v18 }
 0xa7e   :  { %v2404_v40 = vadd.f32 %v2391_v18, %v2373_v37  ;;  %2430 = vrot.lane.b32.xlu1 %v2403_v22, %s3923_s25  ;;  %v3548_v62 = vpop.f32.mrb[78].mxu1 }
 0xa7f   :  { %v2376_v8 = vpop.f32.mrb[79].mxu1  ;;  %v2407_v10 = vadd.f32 %v3548_v62, %v2391_v18 }
 0xa80   :  { %v2405_v3 = vadd.f32 %v2391_v18, %v2376_v8  ;;  %2432 = vrot.lane.b32.xlu0 %v2404_v40, %s3923_s25  ;;  %v4609_v18 = vadd.f32 %v2766_v32, %v4496_v42 }
 0xa82   :  { %2434 = vrot.lane.b32.xlu1 %v2405_v3, %s3923_s25 }
 0xa84   :  { %2436 = vrot.lane.b32.xlu0 %v2406_v25, %s3923_s25  ;;  %v3607_v26 = vpop.f32.mrb[80].mxu1 }
 0xa85   :  { %v2735_v16 = vpop.f32.mrb[81].mxu1 }
 0xa86   :  { %v3608_v47 = vpop.f32.mrb[82].mxu1  ;;  %2438 = vrot.lane.b32.xlu1 %v2407_v10, %s3923_s25 }
 0xa87   :  { %v2737_v35 = vpop.f32.mrb[83].mxu1 }
 0xa8c   :  { %v3611_v55 = vpop.f32.mrb[84].mxu1 }
 0xa8d   :  { %v2747_v54 = vpop.f32.mrb[85].mxu1 }
 0xa8e   :  { %v3612_v7 = vpop.f32.mrb[86].mxu1 }
 0xa8f   :  { %v2749_v6 = vpop.f32.mrb[87].mxu1 }
 0xaa3   :  { %2768 = vmax.xlane.f32.xlu0 %v4609_v18 }
 0xaaa   :  { %2783 = vmax.xlane.f32.xlu1 %v4616_v41 }
 0xada   :  { %v2409_v57 = vpop.permute.xlu0 %2408 }
 0xadb   :  { %v2440_v4 = vadd.f32 %v2409_v57, %v4496_v42 }
 0xadc   :  { %v2411_v43 = vpop.permute.xlu1 %2410 }
 0xadd   :  { %v2441_v63 = vadd.f32 %v2411_v43, %v4498_v53 }
 0xade   :  { %v2413_v2 = vpop.permute.xlu0 %2412 }
 0xadf   :  { %v2456_v52 = vpack.c.bf16 %v2441_v63, %v2440_v4  ;;  %v2442_v11 = vadd.f32 %v2413_v2, %v4500_v58  ;;  %v2760_v63 = vsub.s32 4, %v4065_v56 }
 0xae0   :  { %v2415_v5 = vpop.permute.xlu1 %2414 }
 0xae1   :  { %v2443_v14 = vadd.f32 %v2415_v5, %v4494_v39  ;;  %3565 = vmatprep.mubr.bf16.mxu0 %v2456_v52  ;;  %v2761_v5 = vrot.slane %v4491_v0, %v2760_v63 }
 0xae2   :  { %v2417_v20 = vpop.permute.xlu0 %2416 }
 0xae3   :  { %v2457_v22 = vpack.c.bf16 %v2443_v14, %v2442_v11  ;;  %v2444_v31 = vadd.f32 %v2417_v20, %v4508_v49 }
 0xae4   :  { %v2419_v19 = vpop.permute.xlu1 %2418 }
 0xae5   :  { %v2445_v37 = vadd.f32 %v2419_v19, %v4510_v34  ;;  %3566 = vmatmul.mubr.bf16.vlgmr.msra.gmra.mrb[80].mxu0 %v2457_v22 }
 0xae6   :  { %3582 = vmatpush3.bf16.msra.mxu0 %v4542_v23  ;;  %v2421_v42 = vpop.permute.xlu0 %2420 }
 0xae7   :  { %v2458_v53 = vpack.c.bf16 %v2445_v37, %v2444_v31  ;;  %3583 = vmatprep.subr.bf16.mxu0 %v4546_v60  ;;  %v2446_v58 = vadd.f32 %v2421_v42, %v4512_v48 }
 0xae8   :  { %v2423_v40 = vpop.permute.xlu1 %2422 }
 0xae9   :  { %v2447_v39 = vadd.f32 %v2423_v40, %v4506_v38  ;;  %3569 = vmatprep.mubr.bf16.mxu0 %v2458_v53 }
 0xaea   :  { %3584 = vmatpush3.bf16.msra.mxu0 %v4546_v60  ;;  %v2425_v62 = vpop.permute.xlu0 %2424 }
 0xaeb   :  { %v2459_v8 = vpack.c.bf16 %v2447_v39, %v2446_v58  ;;  %3585 = vmatprep.subr.bf16.mxu0 %v4552_v27  ;;  %v2448_v34 = vadd.f32 %v2425_v62, %v4520_v21 }
 0xaec   :  { %v2427_v49 = vpop.permute.xlu1 %2426 }
 0xaed   :  { %v2449_v23 = vadd.f32 %v2427_v49, %v4522_v61  ;;  %3570 = vmatmul.mubr.bf16.gmra.mrb[84].mxu0 %v2459_v8 }
 0xaee   :  { %3586 = vmatpush3.bf16.msra.mxu0 %v4552_v27  ;;  %v2429_v3 = vpop.permute.xlu0 %2428 }
 0xaef   :  { %v2460_v25 = vpack.c.bf16 %v2449_v23, %v2448_v34  ;;  %3587 = vmatprep.subr.bf16.mxu0 %v4556_v59  ;;  %v2450_v48 = vadd.f32 %v2429_v3, %v4524_v46 }
 0xaf0   :  { %v2431_v38 = vpop.permute.xlu1 %2430 }
 0xaf1   :  { %v2451_v60 = vadd.f32 %v2431_v38, %v4518_v24  ;;  %3573 = vmatprep.mubr.bf16.mxu0 %v2460_v25 }
 0xaf2   :  { %3588 = vmatpush3.bf16.msra.mxu0 %v4556_v59  ;;  %v2433_v10 = vpop.permute.xlu0 %2432 }
 0xaf3   :  { %v2461_v26 = vpack.c.bf16 %v2451_v60, %v2450_v48  ;;  %3589 = vmatprep.subr.bf16.mxu0 %v4562_v29  ;;  %v2452_v61 = vadd.f32 %v2433_v10, %v4532_v13 }
 0xaf4   :  { %v2435_v21 = vpop.permute.xlu1 %2434 }
 0xaf5   :  { %v2453_v27 = vadd.f32 %v2435_v21, %v4534_v44  ;;  %3574 = vmatmul.mubr.bf16.gmra.mrb[88].mxu0 %v2461_v26 }
 0xaf6   :  { %3590 = vmatpush3.bf16.msra.mxu0 %v4562_v29  ;;  %v2437_v16 = vpop.permute.xlu0 %2436 }
 0xaf7   :  { %v2462_v47 = vpack.c.bf16 %v2453_v27, %v2452_v61  ;;  %3591 = vmatprep.subr.bf16.mxu0 %v4566_v17  ;;  %v2454_v46 = vadd.f32 %v2437_v16, %v4536_v28 }
 0xaf8   :  { %v2439_v24 = vpop.permute.xlu1 %2438 }
 0xaf9   :  { %v2455_v59 = vadd.f32 %v2439_v24, %v4530_v9  ;;  %3577 = vmatprep.mubr.bf16.mxu0 %v2462_v47 }
 0xafa   :  { %3592 = vmatpush3.bf16.msra.mxu0 %v4566_v17 }
 0xafb   :  { %v2463_v35 = vpack.c.bf16 %v2455_v59, %v2454_v46  ;;  %3593 = vmatprep.subr.bf16.mxu0 %v4572_v1 }
 0xafd   :  { %3578 = vmatmul.mubr.bf16.gmra.mrb[92].mxu0 %v2463_v35 }
 0xafe   :  { %3594 = vmatpush3.bf16.msra.mxu0 %v4572_v1  ;;  %3597 = vmatprep.mubr.bf16.mxu0 %v4465_v15 }
 0xaff   :  { %3595 = vmatprep.subr.bf16.mxu0 %v4576_v30 }
 0xb02   :  { %3596 = vmatpush3.bf16.msra.mxu0 %v4576_v30 }
 0xb05   :  { %3598 = vmatmul.mubr.bf16.vlgmr.msra.gmra.mrb[96].mxu0 %v4463_v12 }
 0xb06   :  { %3601 = vmatprep.mubr.bf16.mxu0 %v4471_v51 }
 0xb0d   :  { %3602 = vmatmul.mubr.bf16.gmra.mrb[100].mxu0 %v4469_v33 }
 0xb30   :  { %v2769_v33 = vpop.xlane.xlu0 %2768 }
 0xb31   :  { %v2770_v36 = vsub.f32 %v4609_v18, %v2769_v33 }
 0xb33   :  { %v2771_v2 = vmul.f32 1.442695, %v2770_v36 }
 0xb37   :  { %v2784_v9 = vpop.xlane.xlu1 %2783 }
 0xb38   :  { %v2785_v13 = vsub.f32 %v4616_v41, %v2784_v9 }
 0xb3a   :  { %v2786_v44 = vmul.f32 1.442695, %v2785_v13 }
 0xb3c   :  { %3861 = vpow2.f32 %v2786_v44 }
 0xb46   :  { %v3862_v28 = vpop.eup %3861 }
 0xb47   :  { %2788 = vadd.xlane.f32.xlu1 %v3862_v28 }
 0xbb8   :  { %v3567_v29 = vpop.f32.mrb[80].mxu0 }
 0xbb9   :  { %v2580_v17 = vpop.f32.mrb[81].mxu0 }
 0xbba   :  { %v3568_v15 = vpop.f32.mrb[82].mxu0 }
 0xbbb   :  { %v2583_v1 = vpop.f32.mrb[83].mxu0 }
 0xbc0   :  { %v3571_v55 = vpop.f32.mrb[84].mxu0 }
 0xbc1   :  { %v2593_v54 = vpop.f32.mrb[85].mxu0 }
 0xbc2   :  { %v3572_v30 = vpop.f32.mrb[86].mxu0 }
 0xbc3   :  { %v2595_v7 = vpop.f32.mrb[87].mxu0 }
 0xbc8   :  { %v3575_v12 = vpop.f32.mrb[88].mxu0 }
 0xbc9   :  { %v2605_v6 = vpop.f32.mrb[89].mxu0 }
 0xbca   :  { %v3576_v51 = vpop.f32.mrb[90].mxu0 }
 0xbcb   :  { %v2607_v45 = vpop.f32.mrb[91].mxu0 }
 0xbd0   :  { %v3579_v32 = vpop.f32.mrb[92].mxu0 }
 0xbd1   :  { %v2617_v41 = vpop.f32.mrb[93].mxu0 }
 0xbd2   :  { %v3580_v57 = vpop.f32.mrb[94].mxu0 }
 0xbd3   :  { %v2619_v43 = vpop.f32.mrb[95].mxu0 }
 0xbd4   :  { %v2789_v4 = vpop.xlane.xlu1 %2788 }
 0xbd5   :  { %3863 = vlog2.f32 %v2789_v4 }
 0xbd6   :  { %3865 = vpow2.f32 %v2771_v2 }
 0xbd8   :  { %v3599_v52 = vpop.f32.mrb[96].mxu0 }
 0xbd9   :  { %v2710_v11 = vpop.f32.mrb[97].mxu0 }
 0xbda   :  { %v2711_v14 = vadd.f32 %v2710_v11, %v2580_v17  ;;  %v3600_v20 = vpop.f32.mrb[98].mxu0 }
 0xbdb   :  { %v2713_v22 = vpop.f32.mrb[99].mxu0 }
 0xbdc   :  { %v2762_v19 = vadd.f32 %v2761_v5, %v2711_v14 }
 0xbde   :  { %v2793_v31 = vadd.f32 %v4613_v50, %v2762_v19 }
 0xbdf   :  { %v3864_v18 = vpop.eup %3863 }
 0xbe0   :  { %v2791_v37 = vmul.f32 0.6931472, %v3864_v18  ;;  %v3603_v42 = vpop.f32.mrb[100].mxu0  ;;  %2794 = vmax.xlane.f32.xlu0 %v2793_v31  ;;  %v3866_v58 = vpop.eup %3865 }
 0xbe1   :  { %v2723_v53 = vpop.f32.mrb[101].mxu0 }
 0xbe2   :  { %v2792_v40 = vsub.f32 %v2785_v13, %v2791_v37  ;;  %v3604_v56 = vpop.f32.mrb[102].mxu0 }
 0xbe3   :  { %v2725_v39 = vpop.f32.mrb[103].mxu0 }
 0xbe4   :  { %2805 = vst [vmem:[%s4672_s4 + $0x8] sm:$0xff] %v2792_v40  ;;  %2773 = vadd.xlane.f32.xlu0 %v3866_v58 }
 0xc6d   :  { %v2795_v0 = vpop.xlane.xlu0 %2794 }
 0xc6e   :  { %v2796_v62 = vsub.f32 %v2793_v31, %v2795_v0 }
 0xc70   :  { %v2797_v8 = vmul.f32 1.442695, %v2796_v62 }
 0xc71   :  { %v2774_v49 = vpop.xlane.xlu0 %2773 }
 0xc72   :  { %3867 = vpow2.f32 %v2797_v8 }
 0xc73   :  { %3869 = vlog2.f32 %v2774_v49 }
 0xc7c   :  { %v3868_v50 = vpop.eup %3867 }
 0xc7d   :  { %v3870_v34 = vpop.eup %3869  ;;  %2799 = vadd.xlane.f32.xlu0 %v3868_v50 }
 0xc7e   :  { %v2776_v23 = vmul.f32 0.6931472, %v3870_v34 }
 0xc80   :  { %v2777_v3 = vsub.f32 %v2770_v36, %v2776_v23 }
 0xc82   :  { %2804 = vst [vmem:[%s4672_s4] sm:$0xff] %v2777_v3 }
 0xd0a   :  { %v2800_v25 = vpop.xlane.xlu0 %2799 }
 0xd0b   :  { %3871 = vlog2.f32 %v2800_v25 }
 0xd15   :  { %v3872_v38 = vpop.eup %3871 }
 0xd16   :  { %v2802_v48 = vmul.f32 0.6931472, %v3872_v38 }
 0xd18   :  { %v2803_v60 = vsub.f32 %v2796_v62, %v2802_v48 }
 0xd1a   :  { %2806 = vst [vmem:[%s4672_s4 + $0x10] sm:$0xff] %v2803_v60 }
 0xd1b   :  { %2811 = vsyncpa [#allocation3], 1 }
 0xd1c   :  { %2812 = vsyncpa [#allocation5], 1 }

</bundles_post_ra>
